<compile_context>
chip_gen: v7x
topology: tpu7x:2x2x1
jax: 0.10.0
libtpu: 0.0.40
codegen_flags: <defaults>
</compile_context>

<pallas_src>
import math
import functools

import jax
import jax.numpy as jnp
from jax import lax
from jax.experimental import pallas as pl
from jax.experimental.pallas import tpu as pltpu


def _round_up(x, m):
    return (x + m - 1) // m * m


# ---------------------------------------------------------------------------
# Prep kernel: fw = feat @ w ; g = rs * fw (bf16) ; pre_sup = fw + b (f32)
# ---------------------------------------------------------------------------
def _prep_kernel(feat_ref, w_ref, rs_ref, b_ref, *out_refs, var_loss):
    fw = jnp.dot(feat_ref[...], w_ref[...],
                 preferred_element_type=jnp.float32)              # [tk, Dp] f32
    out_refs[0][...] = (rs_ref[...] * fw).astype(jnp.bfloat16)    # g
    if var_loss:
        out_refs[1][...] = fw + b_ref[...]                        # pre_sup


# ---------------------------------------------------------------------------
# Main kernel: h = relu(adj @ g + b)  (+ var-loss partials)
# ---------------------------------------------------------------------------
def _main_kernel(adj_ref, g_ref, b_ref, *rest,
                 tm, tk, n_out_real, n_out_pad, apply_relu, var_loss,
                 g_resident):
    if var_loss:
        h_ref, colsum_ref, hsum_ref, acc_ref = rest
    else:
        h_ref, acc_ref = rest

    k = pl.program_id(1)
    n_k = pl.num_programs(1)

    # program_id must only be called at kernel top level (interpret mode cannot
    # lower program_id nested inside a pl.when / lax.cond branch).
    mask_rows = var_loss and (n_out_pad > n_out_real)
    if mask_rows:
        row_start = pl.program_id(0) * tm

    @pl.when(k == 0)
    def _():
        acc_ref[...] = jnp.zeros_like(acc_ref)

    adj_blk = adj_ref[...]                                        # bf16 [tm, tk]
    if g_resident:
        # g is fully VMEM-resident; slice the k-th N_in tile.
        g_blk = g_ref[pl.ds(k * tk, tk), :]
    else:
        g_blk = g_ref[...]
    acc_ref[...] += jnp.dot(adj_blk, g_blk,
                            preferred_element_type=jnp.float32)

    if var_loss:
        # Column sums of adj via the (otherwise idle) MXU: avoids a tm x tk f32
        # temporary and the cross-sublane XLU reduce inside the mem-bound loop.
        ones8 = jnp.ones((8, tm), jnp.bfloat16)
        cs = jnp.dot(ones8, adj_blk, preferred_element_type=jnp.float32)   # [8, tk]
        colsum_ref[...] = cs[0:1, :].reshape(colsum_ref.shape)             # [1,1,1,tk]

    @pl.when(k == n_k - 1)
    def _():
        h = acc_ref[...] + b_ref[...]
        if apply_relu:
            # TODO(synk): module accepts an arbitrary `activation` callable; ReLU baked in.
            h = jnp.maximum(h, 0.0)
        h_ref[...] = h                         # padded rows sliced off by the wrapper
        if var_loss:
            if mask_rows:
                # Padded N_out rows must not contribute to the h row-sum (mu_v).
                rows = lax.broadcasted_iota(jnp.int32, h.shape, 0) + row_start
                h = jnp.where(rows < n_out_real, h, 0.0)
            hsum_ref[...] = jnp.sum(h, axis=0,
                                    keepdims=True).reshape(hsum_ref.shape)


# ---------------------------------------------------------------------------
# Variance-loss kernel (reduction over N_in tiles)
# ---------------------------------------------------------------------------
def _varloss_kernel(a_ref, p_ref, mu_ref, vl_ref, s1_ref, s2_ref,
                    *, n_in_real, n_out_real):
    k = pl.program_id(0)

    @pl.when(k == 0)
    def _():
        s1_ref[...] = jnp.zeros_like(s1_ref)
        s2_ref[...] = jnp.zeros_like(s2_ref)

    a_row = a_ref[...]                                            # [1, tk]  (colsum/N_in)
    a8 = jnp.broadcast_to(a_row, (8, a_row.shape[-1]))            # full sublane tile
    p = p_ref[...]                                                # [tk, Dp] f32

    s2_ref[...] += jnp.dot(a8, p, preferred_element_type=jnp.float32)
    s1_ref[...] += jnp.dot(a8 * a8, p * p, preferred_element_type=jnp.float32)

    @pl.when(k == pl.num_programs(0) - 1)
    def _():
        mu = mu_ref[...]                                          # [1, Dp]
        s1 = s1_ref[0:1, :]
        s2 = s2_ref[0:1, :]
        per_j = s1 - 2.0 * mu * s2 + float(n_in_real) * mu * mu   # [1, Dp]
        total = jnp.sum(per_j, axis=1, keepdims=True)             # [1, 1]
        vl_ref[...] = total * (1.0 / (float(n_out_real) * float(n_in_real)))


# ---------------------------------------------------------------------------
# Wrapper
# ---------------------------------------------------------------------------
@functools.partial(jax.jit,
                   static_argnames=("activation", "var_loss", "is_test",
                                    "tm", "tk"))
def adap_gconv(adj, hidden_feat, num_sampled_nodes, q_probs, weight, bias,
               activation=True, var_loss=False, is_test=False,
               tm=512, tk=1024):
    n_out, n_in = adj.shape
    d_in, d_out = weight.shape

    do_vl = bool(var_loss) and not is_test

    # Clamp tiles to the problem size; keep >= 2 row tiles when possible so the
    # 'parallel' axis feeds both TensorCores on v7x.
    tm = max(128, min(tm, _round_up(max(n_out // 2, 1), 128)))
    tk = max(128, min(tk, _round_up(n_in, 128)))
    assert tm % 128 == 0 and tk % 128 == 0

    n_out_p = _round_up(n_out, tm)
    n_in_p = _round_up(n_in, tk)
    d_in_p = _round_up(d_in, 128)
    d_out_p = _round_up(d_out, 128)      # lane-dense output (no masked vst)
    n_i = n_out_p // tm
    n_k = n_in_p // tk

    def pad2(x, r, c):
        pr, pc = r - x.shape[0], c - x.shape[1]
        if pr or pc:
            x = jnp.pad(x, ((0, pr), (0, pc)))
        return x

    # Cast FIRST, pad once in the narrow dtype (avoids an extra f32 pass over adj).
    adj_p = pad2(adj.astype(jnp.bfloat16), n_out_p, n_in_p)
    feat_p = pad2(hidden_feat.astype(jnp.bfloat16), n_in_p, d_in_p)
    w_p = pad2(weight.astype(jnp.bfloat16), d_in_p, d_out_p)
    b_p = pad2(jnp.reshape(bias, (1, d_out)).astype(jnp.float32), 1, d_out_p)

    if is_test:
        rs = jnp.ones((n_in, 1), jnp.float32)
    else:
        ns = jnp.asarray(num_sampled_nodes, jnp.float32)
        rs = 1.0 / (jnp.reshape(q_probs, (n_in, 1)).astype(jnp.float32) * ns)
    rs_p = pad2(rs, n_in_p, 1)           # padded rows -> rs = 0 -> g rows = 0

    # ---- prep: fw = feat @ w ; g = rs * fw ; pre_sup = fw + b --------------
    prep_out_shape = [jax.ShapeDtypeStruct((n_in_p, d_out_p), jnp.bfloat16)]
    prep_out_specs = [pl.BlockSpec((tk, d_out_p), lambda k: (k, 0))]
    if do_vl:
        prep_out_shape.append(jax.ShapeDtypeStruct((n_in_p, d_out_p), jnp.float32))
        prep_out_specs.append(pl.BlockSpec((tk, d_out_p), lambda k: (k, 0)))

    prep_outs = pl.pallas_call(
        functools.partial(_prep_kernel, var_loss=do_vl),
        grid=(n_k,),
        in_specs=[
            pl.BlockSpec((tk, d_in_p), lambda k: (k, 0)),
            pl.BlockSpec((d_in_p, d_out_p), lambda k: (0, 0)),
            pl.BlockSpec((tk, 1), lambda k: (k, 0)),
            pl.BlockSpec((1, d_out_p), lambda k: (0, 0)),
        ],
        out_specs=tuple(prep_out_specs),
        out_shape=tuple(prep_out_shape),
        compiler_params=pltpu.CompilerParams(
            dimension_semantics=("parallel",)),
    )(feat_p, w_p, rs_p, b_p)

    g = prep_outs[0]
    p_sup = prep_outs[1] if do_vl else None

    # ---- VMEM budgeting: keep g resident when it fits (v7x-safe 48 MiB) ----
    adj_tile_b = tm * tk * 2
    g_bytes = n_in_p * d_out_p * 2
    out_tile_b = tm * d_out_p * 4
    acc_b = tm * d_out_p * 4
    resident_need = 2 * adj_tile_b + 2 * g_bytes + 2 * out_tile_b + acc_b
    stream_need = 2 * adj_tile_b + 2 * tk * d_out_p * 2 + 2 * out_tile_b + acc_b
    g_resident = resident_need <= (48 << 20)
    main_need = resident_need if g_resident else stream_need
    vmem_limit = int(min(max(2 * main_need, 32 << 20), 100 << 20))

    # ---- main: h = relu(adj @ g + b), tiled over (N_out, N_in) -------------
    main_out_shape = [jax.ShapeDtypeStruct((n_out_p, d_out_p), jnp.float32)]
    main_out_specs = [pl.BlockSpec((tm, d_out_p), lambda i, k: (i, 0))]
    if do_vl:
        main_out_shape += [
            jax.ShapeDtypeStruct((n_i, n_k, 1, tk), jnp.float32),   # adj colsum partials
            jax.ShapeDtypeStruct((n_i, 1, d_out_p), jnp.float32),   # h row-sum partials
        ]
        main_out_specs += [
            pl.BlockSpec((1, 1, 1, tk), lambda i, k: (i, k, 0, 0)),
            pl.BlockSpec((1, 1, d_out_p), lambda i, k: (i, 0, 0)),
        ]

    g_spec = (pl.BlockSpec((n_in_p, d_out_p), lambda i, k: (0, 0)) if g_resident
              else pl.BlockSpec((tk, d_out_p), lambda i, k: (k, 0)))

    cost = pl.CostEstimate(
        flops=2 * n_out_p * n_in_p * d_out_p,
        transcendentals=0,
        bytes_accessed=(n_out_p * n_in_p * 2                       # adj (bf16)
                        + (1 if g_resident else n_i) * g_bytes     # g
                        + n_out_p * d_out_p * 4))                  # h

    main_outs = pl.pallas_call(
        functools.partial(_main_kernel, tm=tm, tk=tk, n_out_real=n_out,
                          n_out_pad=n_out_p, apply_relu=bool(activation),
                          var_loss=do_vl, g_resident=g_resident),
        grid=(n_i, n_k),
        in_specs=[
            pl.BlockSpec((tm, tk), lambda i, k: (i, k)),
            g_spec,
            pl.BlockSpec((1, d_out_p), lambda i, k: (0, 0)),
        ],
        out_specs=tuple(main_out_specs),
        out_shape=tuple(main_out_shape),
        scratch_shapes=[pltpu.VMEM((tm, d_out_p), jnp.float32)],
        compiler_params=pltpu.CompilerParams(
            dimension_semantics=("parallel", "arbitrary"),
            vmem_limit_bytes=vmem_limit),
        cost_estimate=cost,
    )(adj_p, g, b_p)

    h = main_outs[0][:n_out, :d_out]

    if not do_vl:
        return h

    colsum_part, hsum_part = main_outs[1], main_outs[2]
    # Tiny (KB-scale) reductions of the partials; done with plain XLA ops.
    a_all = (colsum_part.sum(axis=(0, 2)) * (1.0 / float(n_in))).reshape(1, n_in_p)
    mu_all = (hsum_part.sum(axis=0) * (1.0 / float(n_out))).reshape(1, d_out_p)

    vl = pl.pallas_call(
        functools.partial(_varloss_kernel, n_in_real=n_in, n_out_real=n_out),
        grid=(n_k,),
        in_specs=[
            pl.BlockSpec((1, tk), lambda k: (0, k)),
            pl.BlockSpec((tk, d_out_p), lambda k: (k, 0)),
            pl.BlockSpec((1, d_out_p), lambda k: (0, 0)),
        ],
        out_specs=pl.BlockSpec((1, 1), lambda k: (0, 0)),
        out_shape=jax.ShapeDtypeStruct((1, 1), jnp.float32),
        scratch_shapes=[pltpu.VMEM((8, d_out_p), jnp.float32),
                        pltpu.VMEM((8, d_out_p), jnp.float32)],
        compiler_params=pltpu.CompilerParams(
            dimension_semantics=("arbitrary",)),
    )(a_all, p_sup, mu_all)

    return h, vl[0, 0]


if __name__ == "__main__":
    key = jax.random.PRNGKey(0)
    k_adj, k_feat, k_q, k_w, k_b = jax.random.split(key, 5)

    N_out, N_in, D_in, D_out = 192, 320, 48, 24

    adj = (jax.random.uniform(k_adj, (N_out, N_in)) < 0.1).astype(jnp.float32)
    hidden_feat = jax.random.normal(k_feat, (N_in, D_in), dtype=jnp.float32)
    q_probs = jax.random.uniform(k_q, (N_in,), jnp.float32, 0.5, 1.5)
    num_sampled_nodes = float(N_in)

    bound = 1.0 / math.sqrt(D_in)
    weight = jax.random.uniform(k_w, (D_in, D_out), jnp.float32, -bound, bound)
    bias = jax.random.uniform(k_b, (1, D_out), jnp.float32, -bound, bound)

    # Training path with variance loss.  Small tiles so the test exercises a
    # real multi-tile grid (N_out_p=256 -> 2 row tiles, N_in_p=384 -> 3 k tiles).
    h, vl = adap_gconv(adj, hidden_feat, num_sampled_nodes, q_probs, weight,
                       bias, activation=True, var_loss=True, is_test=False,
                       tm=128, tk=128)
    jax.block_until_ready((h, vl))

    # Pure-JAX f32 reference of the original module semantics.
    hs = hidden_feat / q_probs[:, None] / num_sampled_nodes
    href = jnp.dot(adj, hs, precision=lax.Precision.HIGHEST)
    href = jnp.dot(href, weight, precision=lax.Precision.HIGHEST) + bias
    href = jnp.maximum(href, 0.0)
    pre_sup = jnp.dot(hidden_feat, weight, precision=lax.Precision.HIGHEST) + bias
    adj_sup_mean = adj.sum(0) / N_in
    mu_v = href.mean(0)
    diff = adj_sup_mean[:, None] * pre_sup - mu_v[None, :]
    vlref = (diff * diff).sum() / N_out / N_in

    assert h.shape == (N_out, D_out)
    assert jnp.allclose(h, href, rtol=2e-2, atol=5e-3), "h mismatch (train path)"
    assert jnp.allclose(vl, vlref, rtol=5e-2, atol=1e-5), "var_loss mismatch"

    # Inference path (is_test=True): no importance re-scaling, no var loss.
    h_test = adap_gconv(adj, hidden_feat, num_sampled_nodes, q_probs, weight,
                        bias, activation=True, var_loss=False, is_test=True,
                        tm=128, tk=128)
    jax.block_until_ready(h_test)
    href_t = jnp.maximum(
        jnp.dot(jnp.dot(adj, hidden_feat, precision=lax.Precision.HIGHEST),
                weight, precision=lax.Precision.HIGHEST) + bias, 0.0)
    assert jnp.allclose(h_test, href_t, rtol=2e-2, atol=1e-1), "h mismatch (test path)"

    print("KERNEL_OK")
</pallas_src>

<mosaic_0001>
module attributes {stable_mosaic.version = 11 : i64} {
  func.func @_prep_kernel(%arg0: i32, %arg1: memref<128x128xbf16, #tpu.memory_space<vmem>>, %arg2: memref<128x128xbf16, #tpu.memory_space<vmem>>, %arg3: memref<128x1xf32, #tpu.memory_space<vmem>>, %arg4: memref<1x128xf32, #tpu.memory_space<vmem>>, %arg5: memref<128x128xbf16, #tpu.memory_space<vmem>>, %arg6: memref<128x128xf32, #tpu.memory_space<vmem>>) attributes {dimension_semantics = [#tpu.dimension_semantics<parallel>], iteration_bounds = array<i64: 3>, scalar_prefetch = 0 : i64, scratch_operands = 0 : i64, tpu.core_type = #tpu.core_type<tc>, window_params = [{transform_indices = @transform_0, window_bounds = array<i64: 128, 128>}, {pipeline_mode = #tpu.pipeline_mode<synchronous>, transform_indices = @transform_1, window_bounds = array<i64: 128, 128>}, {transform_indices = @transform_2, window_bounds = array<i64: 128, 1>}, {pipeline_mode = #tpu.pipeline_mode<synchronous>, transform_indices = @transform_3, window_bounds = array<i64: 1, 128>}, {transform_indices = @transform_4, window_bounds = array<i64: 128, 128>}, {transform_indices = @transform_5, window_bounds = array<i64: 128, 128>}]} {
    %c0 = arith.constant 0 : index
    %c0_0 = arith.constant 0 : index
    %0 = vector.load %arg1[%c0, %c0_0] : memref<128x128xbf16, #tpu.memory_space<vmem>>, vector<128x128xbf16>
    %c0_1 = arith.constant 0 : index
    %c0_2 = arith.constant 0 : index
    %1 = vector.load %arg2[%c0_1, %c0_2] : memref<128x128xbf16, #tpu.memory_space<vmem>>, vector<128x128xbf16>
    %cst = arith.constant dense<0.000000e+00> : vector<128x128xf32>
    %2 = tpu.matmul %0, %1, %cst {dimension_numbers = #tpu.dot_dimension_numbers<[1], [0], [0], [1], [0, 0, 1, 1], [], []>} : vector<128x128xbf16>, vector<128x128xbf16>, vector<128x128xf32> -> vector<128x128xf32>
    %c0_3 = arith.constant 0 : index
    %c0_4 = arith.constant 0 : index
    %3 = vector.load %arg3[%c0_3, %c0_4] : memref<128x1xf32, #tpu.memory_space<vmem>>, vector<128x1xf32>
    %4 = vector.broadcast %3 : vector<128x1xf32> to vector<128x128xf32>
    %5 = arith.mulf %4, %2 : vector<128x128xf32>
    %6 = arith.truncf %5 : vector<128x128xf32> to vector<128x128xbf16>
    %c0_5 = arith.constant 0 : index
    %c0_6 = arith.constant 0 : index
    %7 = vector.load %arg5[%c0_5, %c0_6] : memref<128x128xbf16, #tpu.memory_space<vmem>>, vector<128x128xbf16>
    tpu.vector_store %arg5[%c0_5, %c0_6], %6 {strides = array<i32>} : memref<128x128xbf16, #tpu.memory_space<vmem>>, vector<128x128xbf16>,
    %c0_7 = arith.constant 0 : index
    %c0_8 = arith.constant 0 : index
    %8 = vector.load %arg4[%c0_7, %c0_8] : memref<1x128xf32, #tpu.memory_space<vmem>>, vector<1x128xf32>
    %9 = vector.broadcast %8 : vector<1x128xf32> to vector<128x128xf32>
    %10 = arith.addf %2, %9 : vector<128x128xf32>
    %c0_9 = arith.constant 0 : index
    %c0_10 = arith.constant 0 : index
    %11 = vector.load %arg6[%c0_9, %c0_10] : memref<128x128xf32, #tpu.memory_space<vmem>>, vector<128x128xf32>
    tpu.vector_store %arg6[%c0_9, %c0_10], %10 {strides = array<i32>} : memref<128x128xf32, #tpu.memory_space<vmem>>, vector<128x128xf32>,
    return
  }
  func.func @transform_0(%arg0: i32) -> (i32, i32) {
    %c0_i32 = arith.constant 0 : i32
    %c0_i32_0 = arith.constant 0 : i32
    return %arg0, %c0_i32 : i32, i32
  }
  func.func @transform_1(%arg0: i32) -> (i32, i32) {
    %c0_i32 = arith.constant 0 : i32
    %c0_i32_0 = arith.constant 0 : i32
    %c0_i32_1 = arith.constant 0 : i32
    return %c0_i32, %c0_i32_0 : i32, i32
  }
  func.func @transform_2(%arg0: i32) -> (i32, i32) {
    %c0_i32 = arith.constant 0 : i32
    %c0_i32_0 = arith.constant 0 : i32
    return %arg0, %c0_i32 : i32, i32
  }
  func.func @transform_3(%arg0: i32) -> (i32, i32) {
    %c0_i32 = arith.constant 0 : i32
    %c0_i32_0 = arith.constant 0 : i32
    %c0_i32_1 = arith.constant 0 : i32
    return %c0_i32, %c0_i32_0 : i32, i32
  }
  func.func @transform_4(%arg0: i32) -> (i32, i32) {
    %c0_i32 = arith.constant 0 : i32
    %c0_i32_0 = arith.constant 0 : i32
    return %arg0, %c0_i32 : i32, i32
  }
  func.func @transform_5(%arg0: i32) -> (i32, i32) {
    %c0_i32 = arith.constant 0 : i32
    %c0_i32_0 = arith.constant 0 : i32
    return %arg0, %c0_i32 : i32, i32
  }
}

module attributes {stable_mosaic.version = 11 : i64} {
  func.func @_main_kernel(%arg0: i32, %arg1: i32, %arg2: memref<128x128xbf16, #tpu.memory_space<vmem>>, %arg3: memref<384x128xbf16, #tpu.memory_space<vmem>>, %arg4: memref<1x128xf32, #tpu.memory_space<vmem>>, %arg5: memref<128x128xf32, #tpu.memory_space<vmem>>, %arg6: memref<1x1x1x128xf32, #tpu.memory_space<vmem>>, %arg7: memref<1x1x128xf32, #tpu.memory_space<vmem>>, %arg8: memref<128x128xf32, #tpu.memory_space<vmem>>) attributes {dimension_semantics = [#tpu.dimension_semantics<parallel>, #tpu.dimension_semantics<arbitrary>], iteration_bounds = array<i64: 2, 3>, scalar_prefetch = 0 : i64, scratch_operands = 1 : i64, tpu.core_type = #tpu.core_type<tc>, window_params = [{transform_indices = @transform_0, window_bounds = array<i64: 128, 128>}, {pipeline_mode = #tpu.pipeline_mode<synchronous>, transform_indices = @transform_1, window_bounds = array<i64: 384, 128>}, {pipeline_mode = #tpu.pipeline_mode<synchronous>, transform_indices = @transform_2, window_bounds = array<i64: 1, 128>}, {transform_indices = @transform_3, window_bounds = array<i64: 128, 128>}, {transform_indices = @transform_4, window_bounds = array<i64: 1, 1, 1, 128>}, {transform_indices = @transform_5, window_bounds = array<i64: 1, 1, 128>}]} {
    %c128_i32 = arith.constant 128 : i32
    %0 = arith.muli %arg0, %c128_i32 : i32
    %c0_i32 = arith.constant 0 : i32
    %1 = arith.cmpi eq, %arg1, %c0_i32 : i32
    %2 = arith.extui %1 : i1 to i32
    %c0_i32_0 = arith.constant 0 : i32
    %3 = arith.cmpi ne, %2, %c0_i32_0 : i32
    scf.if %3 {
      %cst_15 = arith.constant 0.000000e+00 : f32
      %20 = vector.broadcast %cst_15 : f32 to vector<128x128xf32>
      %c0_16 = arith.constant 0 : index
      %c0_17 = arith.constant 0 : index
      %21 = vector.load %arg8[%c0_16, %c0_17] : memref<128x128xf32, #tpu.memory_space<vmem>>, vector<128x128xf32>
      tpu.vector_store %arg8[%c0_16, %c0_17], %20 {strides = array<i32>} : memref<128x128xf32, #tpu.memory_space<vmem>>, vector<128x128xf32>,
    } else {
    }
    %c0 = arith.constant 0 : index
    %c0_1 = arith.constant 0 : index
    %4 = vector.load %arg2[%c0, %c0_1] : memref<128x128xbf16, #tpu.memory_space<vmem>>, vector<128x128xbf16>
    %c128_i32_2 = arith.constant 128 : i32
    %5 = arith.muli %arg1, %c128_i32_2 : i32
    %6 = arith.index_cast %5 : i32 to index
    %c0_3 = arith.constant 0 : index
    %7 = vector.load %arg3[%6, %c0_3] : memref<384x128xbf16, #tpu.memory_space<vmem>>, vector<128x128xbf16>
    %c0_4 = arith.constant 0 : index
    %c0_5 = arith.constant 0 : index
    %8 = vector.load %arg8[%c0_4, %c0_5] : memref<128x128xf32, #tpu.memory_space<vmem>>, vector<128x128xf32>
    %cst = arith.constant dense<0.000000e+00> : vector<128x128xf32>
    %9 = tpu.matmul %4, %7, %cst {dimension_numbers = #tpu.dot_dimension_numbers<[1], [0], [0], [1], [0, 0, 1, 1], [], []>} : vector<128x128xbf16>, vector<128x128xbf16>, vector<128x128xf32> -> vector<128x128xf32>
    %10 = arith.addf %8, %9 : vector<128x128xf32>
    %c0_6 = arith.constant 0 : index
    %c0_7 = arith.constant 0 : index
    %11 = vector.load %arg8[%c0_6, %c0_7] : memref<128x128xf32, #tpu.memory_space<vmem>>, vector<128x128xf32>
    tpu.vector_store %arg8[%c0_6, %c0_7], %10 {strides = array<i32>} : memref<128x128xf32, #tpu.memory_space<vmem>>, vector<128x128xf32>,
    %cst_8 = arith.constant 1.000000e+00 : bf16
    %12 = vector.broadcast %cst_8 : bf16 to vector<8x128xbf16>
    %cst_9 = arith.constant dense<0.000000e+00> : vector<8x128xf32>
    %13 = tpu.matmul %12, %4, %cst_9 {dimension_numbers = #tpu.dot_dimension_numbers<[1], [0], [0], [1], [0, 0, 1, 1], [], []>} : vector<8x128xbf16>, vector<128x128xbf16>, vector<8x128xf32> -> vector<8x128xf32>
    %14 = vector.extract_strided_slice %13 {offsets = [0, 0], sizes = [1, 128], strides = [1, 1]} : vector<8x128xf32> to vector<1x128xf32>
    %15 = vector.shape_cast %14 : vector<1x128xf32> to vector<1x1x1x128xf32>
    %c0_10 = arith.constant 0 : index
    %c0_11 = arith.constant 0 : index
    %c0_12 = arith.constant 0 : index
    %c0_13 = arith.constant 0 : index
    %16 = vector.load %arg6[%c0_10, %c0_11, %c0_12, %c0_13] : memref<1x1x1x128xf32, #tpu.memory_space<vmem>>, vector<1x1x1x128xf32>
    tpu.vector_store %arg6[%c0_10, %c0_11, %c0_12, %c0_13], %15 {strides = array<i32>} : memref<1x1x1x128xf32, #tpu.memory_space<vmem>>, vector<1x1x1x128xf32>,
    %c2_i32 = arith.constant 2 : i32
    %17 = arith.cmpi eq, %arg1, %c2_i32 : i32
    %18 = arith.extui %17 : i1 to i32
    %c0_i32_14 = arith.constant 0 : i32
    %19 = arith.cmpi ne, %18, %c0_i32_14 : i32
    scf.if %19 {
      %c0_15 = arith.constant 0 : index
      %c0_16 = arith.constant 0 : index
      %20 = vector.load %arg8[%c0_15, %c0_16] : memref<128x128xf32, #tpu.memory_space<vmem>>, vector<128x128xf32>
      %c0_17 = arith.constant 0 : index
      %c0_18 = arith.constant 0 : index
      %21 = vector.load %arg4[%c0_17, %c0_18] : memref<1x128xf32, #tpu.memory_space<vmem>>, vector<1x128xf32>
      %22 = vector.broadcast %21 : vector<1x128xf32> to vector<128x128xf32>
      %23 = arith.addf %20, %22 : vector<128x128xf32>
      %cst_19 = arith.constant 0.000000e+00 : f32
      %24 = vector.broadcast %cst_19 : f32 to vector<128x128xf32>
      %25 = arith.maximumf %23, %24 : vector<128x128xf32>
      %c0_20 = arith.constant 0 : index
      %c0_21 = arith.constant 0 : index
      %26 = vector.load %arg5[%c0_20, %c0_21] : memref<128x128xf32, #tpu.memory_space<vmem>>, vector<128x128xf32>
      tpu.vector_store %arg5[%c0_20, %c0_21], %25 {strides = array<i32>} : memref<128x128xf32, #tpu.memory_space<vmem>>, vector<128x128xf32>,
      %27 = tpu.iota {dimensions = array<i32: 0>} : vector<128x128xi32>
      %28 = vector.broadcast %0 : i32 to vector<128x128xi32>
      %29 = arith.addi %27, %28 : vector<128x128xi32>
      %c192_i32 = arith.constant 192 : i32
      %30 = vector.broadcast %c192_i32 : i32 to vector<128x128xi32>
      %31 = arith.cmpi slt, %29, %30 : vector<128x128xi32>
      %cst_22 = arith.constant 0.000000e+00 : f32
      %32 = vector.broadcast %cst_22 : f32 to vector<128x128xf32>
      %33 = arith.select %31, %25, %32 : vector<128x128xi1>, vector<128x128xf32>
      %cst_23 = arith.constant dense<0.000000e+00> : vector<128xf32>
      %34 = vector.multi_reduction <add>, %33, %cst_23 [0] : vector<128x128xf32> to vector<128xf32>
      %35 = vector.shape_cast %34 : vector<128xf32> to vector<1x128xf32>
      %36 = vector.shape_cast %35 : vector<1x128xf32> to vector<1x1x128xf32>
      %c0_24 = arith.constant 0 : index
      %c0_25 = arith.constant 0 : index
      %c0_26 = arith.constant 0 : index
      %37 = vector.load %arg7[%c0_24, %c0_25, %c0_26] : memref<1x1x128xf32, #tpu.memory_space<vmem>>, vector<1x1x128xf32>
      tpu.vector_store %arg7[%c0_24, %c0_25, %c0_26], %36 {strides = array<i32>} : memref<1x1x128xf32, #tpu.memory_space<vmem>>, vector<1x1x128xf32>,
    } else {
    }
    return
  }
  func.func @transform_0(%arg0: i32, %arg1: i32) -> (i32, i32) {
    %c0_i32 = arith.constant 0 : i32
    return %arg0, %arg1 : i32, i32
  }
  func.func @transform_1(%arg0: i32, %arg1: i32) -> (i32, i32) {
    %c0_i32 = arith.constant 0 : i32
    %c0_i32_0 = arith.constant 0 : i32
    %c0_i32_1 = arith.constant 0 : i32
    return %c0_i32, %c0_i32_0 : i32, i32
  }
  func.func @transform_2(%arg0: i32, %arg1: i32) -> (i32, i32) {
    %c0_i32 = arith.constant 0 : i32
    %c0_i32_0 = arith.constant 0 : i32
    %c0_i32_1 = arith.constant 0 : i32
    return %c0_i32, %c0_i32_0 : i32, i32
  }
  func.func @transform_3(%arg0: i32, %arg1: i32) -> (i32, i32) {
    %c0_i32 = arith.constant 0 : i32
    %c0_i32_0 = arith.constant 0 : i32
    return %arg0, %c0_i32 : i32, i32
  }
  func.func @transform_4(%arg0: i32, %arg1: i32) -> (i32, i32, i32, i32) {
    %c0_i32 = arith.constant 0 : i32
    %c0_i32_0 = arith.constant 0 : i32
    %c0_i32_1 = arith.constant 0 : i32
    return %arg0, %arg1, %c0_i32, %c0_i32_0 : i32, i32, i32, i32
  }
  func.func @transform_5(%arg0: i32, %arg1: i32) -> (i32, i32, i32) {
    %c0_i32 = arith.constant 0 : i32
    %c0_i32_0 = arith.constant 0 : i32
    %c0_i32_1 = arith.constant 0 : i32
    return %arg0, %c0_i32, %c0_i32_0 : i32, i32, i32
  }
}

module attributes {stable_mosaic.version = 11 : i64} {
  func.func @_varloss_kernel(%arg0: i32, %arg1: memref<1x128xf32, #tpu.memory_space<vmem>>, %arg2: memref<128x128xf32, #tpu.memory_space<vmem>>, %arg3: memref<1x128xf32, #tpu.memory_space<vmem>>, %arg4: memref<1x1xf32, #tpu.memory_space<vmem>>, %arg5: memref<8x128xf32, #tpu.memory_space<vmem>>, %arg6: memref<8x128xf32, #tpu.memory_space<vmem>>) attributes {dimension_semantics = [#tpu.dimension_semantics<arbitrary>], iteration_bounds = array<i64: 3>, scalar_prefetch = 0 : i64, scratch_operands = 2 : i64, tpu.core_type = #tpu.core_type<tc>, window_params = [{transform_indices = @transform_0, window_bounds = array<i64: 1, 128>}, {transform_indices = @transform_1, window_bounds = array<i64: 128, 128>}, {pipeline_mode = #tpu.pipeline_mode<synchronous>, transform_indices = @transform_2, window_bounds = array<i64: 1, 128>}, {pipeline_mode = #tpu.pipeline_mode<synchronous>, transform_indices = @transform_3, window_bounds = array<i64: 1, 1>}]} {
    %c0_i32 = arith.constant 0 : i32
    %0 = arith.cmpi eq, %arg0, %c0_i32 : i32
    %1 = arith.extui %0 : i1 to i32
    %c0_i32_0 = arith.constant 0 : i32
    %2 = arith.cmpi ne, %1, %c0_i32_0 : i32
    scf.if %2 {
      %cst_14 = arith.constant 0.000000e+00 : f32
      %20 = vector.broadcast %cst_14 : f32 to vector<8x128xf32>
      %c0_15 = arith.constant 0 : index
      %c0_16 = arith.constant 0 : index
      %21 = vector.load %arg5[%c0_15, %c0_16] : memref<8x128xf32, #tpu.memory_space<vmem>>, vector<8x128xf32>
      tpu.vector_store %arg5[%c0_15, %c0_16], %20 {strides = array<i32>} : memref<8x128xf32, #tpu.memory_space<vmem>>, vector<8x128xf32>,
      %cst_17 = arith.constant 0.000000e+00 : f32
      %22 = vector.broadcast %cst_17 : f32 to vector<8x128xf32>
      %c0_18 = arith.constant 0 : index
      %c0_19 = arith.constant 0 : index
      %23 = vector.load %arg6[%c0_18, %c0_19] : memref<8x128xf32, #tpu.memory_space<vmem>>, vector<8x128xf32>
      tpu.vector_store %arg6[%c0_18, %c0_19], %22 {strides = array<i32>} : memref<8x128xf32, #tpu.memory_space<vmem>>, vector<8x128xf32>,
    } else {
    }
    %c0 = arith.constant 0 : index
    %c0_1 = arith.constant 0 : index
    %3 = vector.load %arg1[%c0, %c0_1] : memref<1x128xf32, #tpu.memory_space<vmem>>, vector<1x128xf32>
    %4 = vector.shape_cast %3 : vector<1x128xf32> to vector<1x128xf32>
    %5 = vector.broadcast %4 : vector<1x128xf32> to vector<8x128xf32>
    %c0_2 = arith.constant 0 : index
    %c0_3 = arith.constant 0 : index
    %6 = vector.load %arg2[%c0_2, %c0_3] : memref<128x128xf32, #tpu.memory_space<vmem>>, vector<128x128xf32>
    %c0_4 = arith.constant 0 : index
    %c0_5 = arith.constant 0 : index
    %7 = vector.load %arg6[%c0_4, %c0_5] : memref<8x128xf32, #tpu.memory_space<vmem>>, vector<8x128xf32>
    %cst = arith.constant dense<0.000000e+00> : vector<8x128xf32>
    %8 = tpu.matmul %5, %6, %cst {dimension_numbers = #tpu.dot_dimension_numbers<[1], [0], [0], [1], [0, 0, 1, 1], [], []>} : vector<8x128xf32>, vector<128x128xf32>, vector<8x128xf32> -> vector<8x128xf32>
    %9 = arith.addf %7, %8 : vector<8x128xf32>
    %c0_6 = arith.constant 0 : index
    %c0_7 = arith.constant 0 : index
    %10 = vector.load %arg6[%c0_6, %c0_7] : memref<8x128xf32, #tpu.memory_space<vmem>>, vector<8x128xf32>
    tpu.vector_store %arg6[%c0_6, %c0_7], %9 {strides = array<i32>} : memref<8x128xf32, #tpu.memory_space<vmem>>, vector<8x128xf32>,
    %c0_8 = arith.constant 0 : index
    %c0_9 = arith.constant 0 : index
    %11 = vector.load %arg5[%c0_8, %c0_9] : memref<8x128xf32, #tpu.memory_space<vmem>>, vector<8x128xf32>
    %12 = arith.mulf %5, %5 : vector<8x128xf32>
    %13 = arith.mulf %6, %6 : vector<128x128xf32>
    %cst_10 = arith.constant dense<0.000000e+00> : vector<8x128xf32>
    %14 = tpu.matmul %12, %13, %cst_10 {dimension_numbers = #tpu.dot_dimension_numbers<[1], [0], [0], [1], [0, 0, 1, 1], [], []>} : vector<8x128xf32>, vector<128x128xf32>, vector<8x128xf32> -> vector<8x128xf32>
    %15 = arith.addf %11, %14 : vector<8x128xf32>
    %c0_11 = arith.constant 0 : index
    %c0_12 = arith.constant 0 : index
    %16 = vector.load %arg5[%c0_11, %c0_12] : memref<8x128xf32, #tpu.memory_space<vmem>>, vector<8x128xf32>
    tpu.vector_store %arg5[%c0_11, %c0_12], %15 {strides = array<i32>} : memref<8x128xf32, #tpu.memory_space<vmem>>, vector<8x128xf32>,
    %c2_i32 = arith.constant 2 : i32
    %17 = arith.cmpi eq, %arg0, %c2_i32 : i32
    %18 = arith.extui %17 : i1 to i32
    %c0_i32_13 = arith.constant 0 : i32
    %19 = arith.cmpi ne, %18, %c0_i32_13 : i32
    scf.if %19 {
      %c0_14 = arith.constant 0 : index
      %c0_15 = arith.constant 0 : index
      %20 = vector.load %arg3[%c0_14, %c0_15] : memref<1x128xf32, #tpu.memory_space<vmem>>, vector<1x128xf32>
      %c0_16 = arith.constant 0 : index
      %c0_17 = arith.constant 0 : index
      %21 = vector.load %arg5[%c0_16, %c0_17] : memref<8x128xf32, #tpu.memory_space<vmem>>, vector<1x128xf32>
      %c0_18 = arith.constant 0 : index
      %c0_19 = arith.constant 0 : index
      %22 = vector.load %arg6[%c0_18, %c0_19] : memref<8x128xf32, #tpu.memory_space<vmem>>, vector<1x128xf32>
      %cst_20 = arith.constant 2.000000e+00 : f32
      %23 = vector.broadcast %cst_20 : f32 to vector<1x128xf32>
      %24 = arith.mulf %23, %20 : vector<1x128xf32>
      %25 = arith.mulf %24, %22 : vector<1x128xf32>
      %26 = arith.subf %21, %25 : vector<1x128xf32>
      %cst_21 = arith.constant 3.200000e+02 : f32
      %27 = vector.broadcast %cst_21 : f32 to vector<1x128xf32>
      %28 = arith.mulf %27, %20 : vector<1x128xf32>
      %29 = arith.mulf %28, %20 : vector<1x128xf32>
      %30 = arith.addf %26, %29 : vector<1x128xf32>
      %cst_22 = arith.constant dense<0.000000e+00> : vector<1xf32>
      %31 = vector.multi_reduction <add>, %30, %cst_22 [1] : vector<1x128xf32> to vector<1xf32>
      %32 = vector.shape_cast %31 : vector<1xf32> to vector<1x1xf32>
      %cst_23 = arith.constant 1.62760425E-5 : f32
      %33 = vector.broadcast %cst_23 : f32 to vector<1x1xf32>
      %34 = arith.mulf %32, %33 : vector<1x1xf32>
      %c0_24 = arith.constant 0 : index
      %c0_25 = arith.constant 0 : index
      %35 = vector.load %arg4[%c0_24, %c0_25] : memref<1x1xf32, #tpu.memory_space<vmem>>, vector<1x1xf32>
      tpu.vector_store %arg4[%c0_24, %c0_25], %34 {strides = array<i32>} : memref<1x1xf32, #tpu.memory_space<vmem>>, vector<1x1xf32>,
    } else {
    }
    return
  }
  func.func @transform_0(%arg0: i32) -> (i32, i32) {
    %c0_i32 = arith.constant 0 : i32
    %c0_i32_0 = arith.constant 0 : i32
    return %c0_i32, %arg0 : i32, i32
  }
  func.func @transform_1(%arg0: i32) -> (i32, i32) {
    %c0_i32 = arith.constant 0 : i32
    %c0_i32_0 = arith.constant 0 : i32
    return %arg0, %c0_i32 : i32, i32
  }
  func.func @transform_2(%arg0: i32) -> (i32, i32) {
    %c0_i32 = arith.constant 0 : i32
    %c0_i32_0 = arith.constant 0 : i32
    %c0_i32_1 = arith.constant 0 : i32
    return %c0_i32, %c0_i32_0 : i32, i32
  }
  func.func @transform_3(%arg0: i32) -> (i32, i32) {
    %c0_i32 = arith.constant 0 : i32
    %c0_i32_0 = arith.constant 0 : i32
    %c0_i32_1 = arith.constant 0 : i32
    return %c0_i32, %c0_i32_0 : i32, i32
  }
}

</mosaic_0001>

<bundles_post_ra>
// kernel: adap_gconv.4
= control target key start
LH: loop header
LB: loop body
LE: loop exit
PB: predicated region body
PF: predicated region fallthrough
CT: control target
= control target key end

     0   :  { %s1544_s0 = inlined_call_operand.vmem [shape: bf16[256,384], index: 0, kind: input, shape index: {}]   ;;  %s1545_s1 = inlined_call_operand.vmem [shape: bf16[384,128], index: 1, kind: input, shape index: {}]   ;;  %s1546_s2 = inlined_call_operand.vmem [shape: f32[1,128], index: 2, kind: input, shape index: {}]   ;;  %s1547_s3 = inlined_call_operand.vmem [shape: f32[256,128], index: 3, kind: output, shape index: {0}]   ;;  %s1548_s4 = inlined_call_operand.vmem [shape: f32[2,3,1,128], index: 4, kind: output, shape index: {1}]   ;;  %s1549_s5 = inlined_call_operand.vmem [shape: f32[2,1,128], index: 5, kind: output, shape index: {2}]  }
   0x1   :  { %1550 = sst [smem:[#allocation4_spill]] %s1544_s0 }
   0x2   :  { %s1302_s18 = smov 0   ;;  %s1304_s19 = smov 0  }
   0x3   :  { %s1306_s20 = smov 0   ;;  %s1308_s21 = smov 0  }
   0x4   :  { %s1310_s22 = smov 0   ;;  %s1312_s23 = smov 0  }
   0x5   :  { %s1314_s24 = smov 0  }
   0x6 LB: > { %s25_s25 = sadd.s32 1, %s1258_s22  ;;  %s28_s26 = sadd.s32 1, %s1262_s23  ;;  %s1266_s24 = sphi %s1314_s24, %s16_s24   ;;  %s1262_s23 = sphi %s1312_s23, %s1557_s23   ;;  %s1258_s22 = sphi %s1310_s22, %s1556_s22   ;;  %s1254_s21 = sphi %s1308_s21, %s1555_s21   ;;  %s1250_s20 = sphi %s1306_s20, %s1554_s20   ;;  %s1246_s19 = sphi %s1304_s19, %s1553_s19   ;;  %s1242_s18 = sphi %s1302_s18, %s1552_s18  }
   0x7   : > { %p26_p0 = scmp.ge.s32.totalorder %s25_s25, 3  ;;  %p44_p1 = scmp.ne.s32.totalorder %s1246_s19, %s1242_s18 }
   0x8   : > { %p45_p2 = scmp.eq.s32.totalorder %s1266_s24, 0  ;;  %s37_s30 = sadd.s32 1, %s1246_s19 }
   0x9   : > { %s1559_s25 = smov (%p26_p0, %s25_s25), 0  ;;  %s1561_s26 = smov (!%p26_p0, %s28_s26), %s1262_s23 }
   0xa   : > { %p46_p3 = por %p45_p2, %p44_p1  ;;  %p30_p4 = scmp.ge.s32.totalorder %s1561_s26, 2 }
   0xb   : > { %s33_s27 = ssub.s32 %s1258_s22, %s1559_s25  ;;  %p1024_p6 = scmp.ge.s32.totalorder %s1266_s24, 6 }
   0xc   : > { %s1563_s26 = smov (%p30_p4, %s1561_s26), 0 }
   0xd   : > { %s32_s28 = ssub.s32 %s1262_s23, %s1563_s26  ;;  %198 = sbr.rel (%p1024_p6) target bundleno = 40 (0x28), region = 24 }
   0xe   : > { %s34_s29 = sor.u32 %s33_s27, %s32_s28 }
   0xf   : > { %p35_p5 = scmp.eq.s32.totalorder %s34_s29, 0 }
  0x11   : > { %s1353_s6 = scalar_select %p35_p5, %s1246_s19, %s37_s30  }
  0x14   : > { %201 = sbr.rel (!%p46_p3) target bundleno = 40 (0x28), region = 28  ;;  %s203_s7 = sand.u32 (%p46_p3), 1, %s1246_s19  }
  0x15   : > { %s1134_s8 = smul.u32 (%p46_p3), 48, %s1262_s23  ;;  %s1025_s9 = sshll.u32 (%p46_p3), %s203_s7, 6 }
  0x16   : > { %s1551_s0 = sld [smem:[#allocation4_spill]] (%p46_p3)  ;;  %s205_s15 = scalar_lea.vmem (%p46_p3), [#allocation3], %s1025_s9 }
  0x17   : > { %s208_s10 = sadd.s32 (%p46_p3), %s1258_s22, %s1134_s8 }
  0x18   : > { %s1028_s11 = sshll.u32 (%p46_p3), %s208_s10, 2 }
  0x1c   : > { %s1362_s14 = scalar_lea.vmem %s1551_s0, %s1028_s11 }
  0x1d   : > { %v226_v0 = vld [vmem:[%s1362_s14] sm:$0xf]  ;;  %v228_v1 = vld [vmem:[%s1362_s14 + $0xc] sm:$0xf]  ;;  %v230_v2 = vld [vmem:[%s1362_s14 + $0x18] sm:$0xf] }
  0x1e   : > { %227 = vst [vmem:[%s205_s15] sm:$0xf] %v226_v0  ;;  %229 = vst [vmem:[%s205_s15 + $0x4] sm:$0xf] %v228_v1  ;;  %v232_v3 = vld [vmem:[%s1362_s14 + $0x24] sm:$0xf] }
  0x1f   : > { %231 = vst [vmem:[%s205_s15 + $0x8] sm:$0xf] %v230_v2  ;;  %v234_v4 = vld [vmem:[%s1362_s14 + $0x30] sm:$0xf]  ;;  %v236_v5 = vld [vmem:[%s1362_s14 + $0x3c] sm:$0xf] }
  0x20   : > { %233 = vst [vmem:[%s205_s15 + $0xc] sm:$0xf] %v232_v3  ;;  %235 = vst [vmem:[%s205_s15 + $0x10] sm:$0xf] %v234_v4  ;;  %v238_v6 = vld [vmem:[%s1362_s14 + $0x48] sm:$0xf] }
  0x21   : > { %237 = vst [vmem:[%s205_s15 + $0x14] sm:$0xf] %v236_v5  ;;  %v240_v7 = vld [vmem:[%s1362_s14 + $0x54] sm:$0xf]  ;;  %v242_v8 = vld [vmem:[%s1362_s14 + $0x60] sm:$0xf] }
  0x22   : > { %239 = vst [vmem:[%s205_s15 + $0x18] sm:$0xf] %v238_v6  ;;  %241 = vst [vmem:[%s205_s15 + $0x1c] sm:$0xf] %v240_v7  ;;  %v244_v9 = vld [vmem:[%s1362_s14 + $0x6c] sm:$0xf] }
  0x23   : > { %243 = vst [vmem:[%s205_s15 + $0x20] sm:$0xf] %v242_v8  ;;  %v246_v10 = vld [vmem:[%s1362_s14 + $0x78] sm:$0xf]  ;;  %v248_v11 = vld [vmem:[%s1362_s14 + $0x84] sm:$0xf] }
  0x24   : > { %245 = vst [vmem:[%s205_s15 + $0x24] sm:$0xf] %v244_v9  ;;  %247 = vst [vmem:[%s205_s15 + $0x28] sm:$0xf] %v246_v10  ;;  %v250_v12 = vld [vmem:[%s1362_s14 + $0x90] sm:$0xf] }
  0x25   : > { %249 = vst [vmem:[%s205_s15 + $0x2c] sm:$0xf] %v248_v11  ;;  %v252_v13 = vld [vmem:[%s1362_s14 + $0x9c] sm:$0xf]  ;;  %v254_v14 = vld [vmem:[%s1362_s14 + $0xa8] sm:$0xf] }
  0x26   : > { %251 = vst [vmem:[%s205_s15 + $0x30] sm:$0xf] %v250_v12  ;;  %253 = vst [vmem:[%s205_s15 + $0x34] sm:$0xf] %v252_v13  ;;  %v256_v15 = vld [vmem:[%s1362_s14 + $0xb4] sm:$0xf] }
  0x27   : > { %255 = vst [vmem:[%s205_s15 + $0x38] sm:$0xf] %v254_v14  ;;  %257 = vst [vmem:[%s205_s15 + $0x3c] sm:$0xf] %v256_v15 }
  0x28 PF: > { %p1029_p7 = scmp.ge.s32.totalorder %s1266_s24, 1  ;;  %p311_p8 = scmp.lt.s32.totalorder %s1266_s24, 7 }
  0x2a   : > { %p312_p9 = pnand %p1029_p7, %p311_p8 }
  0x2b   : > { %s318_s16 = sand.u32 (!%p312_p9), 1, %s1242_s18   ;;  %s1031_s17 = sshll.u32 (!%p312_p9), %s1254_s21, 4 }
  0x2c   : > { %315 = sbr.rel (%p312_p9) target bundleno = 376 (0x178), region = 69  ;;  %s1030_s27 = sshll.u32 (!%p312_p9), %s318_s16, 6 }
  0x2d   : > { %p357_p10 = scmp.lt.s32.totalorder (!%p312_p9), %s1031_s17, 31  ;;  %p362_p11 = scmp.lt.s32.totalorder (!%p312_p9), %s1254_s21, 1 }
  0x2e   : > { %p364_p12 = scmp.lt.s32.totalorder (!%p312_p9), %s1250_s20, 2  ;;  %s1033_s13 = sshll.u32 (!%p312_p9), %s1254_s21, 7 }
  0x2f   : > { %s1407_s0 = scalar_lea.vmem (!%p312_p9), [#allocation3], %s1030_s27  ;;  %p1034_p13 = scmp.ne.s32.totalorder (!%p312_p9), %s1250_s20, 0 }
  0x33   : > { %s1565_s17 = smov (!%p357_p10, %s1031_s17), 31  ;;  %v1268_v16 = vmov (!%p1034_p13), 0.0  }
  0x34   : > { %s1386_s28 = scalar_select %p362_p11, %s1254_s21, 1 }
  0x35   : > { %s1032_s29 = sshll.u32 %s1565_s17, 3  ;;  %378 = sbr.rel (%p1034_p13) target bundleno = 62 (0x3e), region = 77  ;;  %379 = vst [vmem:[#allocation2] sm:$0xff] (!%p1034_p13), %v1268_v16  ;;  %380 = vst [vmem:[#allocation2 + $0x8] sm:$0xff] (!%p1034_p13), %v1268_v16 }
  0x36   : > { %s1392_s8 = scalar_lea.vmem %s1547_s3, %s1032_s29  ;;  %s1135_s9 = smul.u32 3, %s1386_s28  ;;  %381 = vst [vmem:[#allocation2 + $0x10] sm:$0xff] (!%p1034_p13), %v1268_v16  ;;  %382 = vst [vmem:[#allocation2 + $0x18] sm:$0xff] (!%p1034_p13), %v1268_v16 }
  0x37   : > { %s365_s10 = scalar_select %p364_p12, %s1250_s20, 2 }
  0x38   : > { %s371_s12 = scalar_lea.vmem %s1549_s5, %s1386_s28  ;;  %383 = vst [vmem:[#allocation2 + $0x20] sm:$0xff] (!%p1034_p13), %v1268_v16  ;;  %384 = vst [vmem:[#allocation2 + $0x28] sm:$0xff] (!%p1034_p13), %v1268_v16 }
  0x39   : > { %s1401_s14 = sadd.s32 %s1135_s9, %s365_s10  ;;  %385 = vst [vmem:[#allocation2 + $0x30] sm:$0xff] (!%p1034_p13), %v1268_v16  ;;  %386 = vst [vmem:[#allocation2 + $0x38] sm:$0xff] (!%p1034_p13), %v1268_v16 }
  0x3a   : > { %s368_s17 = scalar_lea.vmem %s1548_s4, %s1401_s14  ;;  %387 = vst [vmem:[#allocation2 + $0x40] sm:$0xff] (!%p1034_p13), %v1268_v16  ;;  %388 = vst [vmem:[#allocation2 + $0x48] sm:$0xff] (!%p1034_p13), %v1268_v16 }
  0x3b   : > { %389 = vst [vmem:[#allocation2 + $0x50] sm:$0xff] (!%p1034_p13), %v1268_v16  ;;  %390 = vst [vmem:[#allocation2 + $0x58] sm:$0xff] (!%p1034_p13), %v1268_v16 }
  0x3c   : > { %391 = vst [vmem:[#allocation2 + $0x60] sm:$0xff] %v1268_v16  ;;  %392 = vst [vmem:[#allocation2 + $0x68] sm:$0xff] %v1268_v16 }
  0x3d   : > { %393 = vst [vmem:[#allocation2 + $0x70] sm:$0xff] %v1268_v16  ;;  %394 = vst [vmem:[#allocation2 + $0x78] sm:$0xff] %v1268_v16 }
  0x3e PF: > { %s1035_s27 = sshll.u32 %s1250_s20, 7  ;;  %v1269_v17 = vmov 0.0   ;;  %v1203_v18 = vld [vmem:[%s1407_s0] sm:$0xff]   ;;  %v1205_v19 = vld [vmem:[%s1407_s0 + $0x8] sm:$0xff]   ;;  %vm1270_vm0 = vmmov 0   ;;  %v1206_v22 = vld [vmem:[%s1407_s0 + $0x10] sm:$0xff]  }
  0x3f   : > { %s412_s29 = sshra.s32 %s1035_s27, 3  ;;  %1114 = vmatprep.subr.bf16.mxu1 %v1269_v17  ;;  %1098 = vmatprep.mubr.bf16.mxu0 %v1203_v18  ;;  %v1207_v25 = vld [vmem:[%s1407_s0 + $0x18] sm:$0xff]   ;;  %v1208_v26 = vld [vmem:[%s1407_s0 + $0x20] sm:$0xff]   ;;  %v1209_v28 = vld [vmem:[%s1407_s0 + $0x28] sm:$0xff]   ;;  %v1271_v34 = vmov 1065369472  }
  0x40   : > { %s1036_s30 = sshll.u32 %s412_s29, 2  ;;  %1115 = vmatpush3.bf16.msra.mxu1 %v1203_v18  ;;  %1130 = vmatprep.mubr.msk.bf16.mxu1 %vm1270_vm0, %v1269_v17  ;;  %v1210_v30 = vld [vmem:[%s1407_s0 + $0x30] sm:$0xff]   ;;  %v1211_v32 = vld [vmem:[%s1407_s0 + $0x38] sm:$0xff]   ;;  %v432_v39 = vld [vmem:[#allocation2] sm:$0xff]  ;;  %p1053_p0 = scmp.ne.s32.totalorder %s1250_s20, 2 }
  0x41   : > { %s1415_s10 = scalar_lea.vmem %s1545_s1, %s1036_s30  ;;  %1116 = vmatprep.subr.bf16.mxu1 %v1269_v17  ;;  %v434_v37 = vld [vmem:[#allocation2 + $0x10] sm:$0xff]  ;;  %v435_v42 = vld [vmem:[#allocation2 + $0x18] sm:$0xff]  ;;  %v433_v45 = vld [vmem:[#allocation2 + $0x8] sm:$0xff] }
  0x42   : > { %v1196_v20 = vld [vmem:[%s1415_s10] sm:$0xff]   ;;  %v1197_v21 = vld [vmem:[%s1415_s10 + $0x8] sm:$0xff]   ;;  %v1198_v23 = vld [vmem:[%s1415_s10 + $0x10] sm:$0xff]  }
  0x43   : > { %1082 = vmatprep.subr.bf16.mxu0 %v1196_v20  ;;  %v1199_v24 = vld [vmem:[%s1415_s10 + $0x18] sm:$0xff]   ;;  %v1200_v27 = vld [vmem:[%s1415_s10 + $0x20] sm:$0xff]   ;;  %v1201_v29 = vld [vmem:[%s1415_s10 + $0x28] sm:$0xff]  }
  0x44   : > { %1083 = vmatpush3.bf16.msra.mxu0 %v1196_v20  ;;  %1117 = vmatpush3.bf16.msra.mxu1 %v1205_v19  ;;  %v1202_v31 = vld [vmem:[%s1415_s10 + $0x30] sm:$0xff]   ;;  %v1204_v33 = vld [vmem:[%s1415_s10 + $0x38] sm:$0xff]   ;;  %v436_v52 = vld [vmem:[#allocation2 + $0x20] sm:$0xff] }
  0x45   : > { %1084 = vmatprep.subr.bf16.mxu0 %v1197_v21  ;;  %1118 = vmatprep.subr.bf16.mxu1 %v1269_v17  ;;  %v438_v51 = vld [vmem:[#allocation2 + $0x30] sm:$0xff]  ;;  %v439_v54 = vld [vmem:[#allocation2 + $0x38] sm:$0xff]  ;;  %v437_v57 = vld [vmem:[#allocation2 + $0x28] sm:$0xff] }
  0x46   : > { %v442_v63 = vld [vmem:[#allocation2 + $0x50] sm:$0xff]  ;;  %v440_v0 = vld [vmem:[#allocation2 + $0x40] sm:$0xff]  ;;  %v443_v2 = vld [vmem:[#allocation2 + $0x58] sm:$0xff] }
  0x47   : > { %v441_v5 = vld [vmem:[#allocation2 + $0x48] sm:$0xff]  ;;  %v446_v11 = vld [vmem:[#allocation2 + $0x70] sm:$0xff]  ;;  %v444_v12 = vld [vmem:[#allocation2 + $0x60] sm:$0xff] }
  0x48   : > { %1085 = vmatpush3.bf16.msra.mxu0 %v1197_v21  ;;  %1119 = vmatpush3.bf16.msra.mxu1 %v1206_v22  ;;  %v447_v14 = vld [vmem:[#allocation2 + $0x78] sm:$0xff] }
  0x49   : > { %1086 = vmatprep.subr.bf16.mxu0 %v1198_v23  ;;  %1120 = vmatprep.subr.bf16.mxu1 %v1269_v17 }
  0x4c   : > { %1087 = vmatpush3.bf16.msra.mxu0 %v1198_v23  ;;  %1121 = vmatpush3.bf16.msra.mxu1 %v1207_v25 }
  0x4d   : > { %1088 = vmatprep.subr.bf16.mxu0 %v1199_v24  ;;  %1122 = vmatprep.subr.bf16.mxu1 %v1269_v17 }
  0x50   : > { %1089 = vmatpush3.bf16.msra.mxu0 %v1199_v24  ;;  %1123 = vmatpush3.bf16.msra.mxu1 %v1208_v26  ;;  %v1441_v24 = vld [vmem:[%s1546_s2] ss:$0 sm:$0xff] (!%p1053_p0) }
  0x51   : > { %1090 = vmatprep.subr.bf16.mxu0 %v1200_v27  ;;  %1124 = vmatprep.subr.bf16.mxu1 %v1269_v17 }
  0x54   : > { %1091 = vmatpush3.bf16.msra.mxu0 %v1200_v27  ;;  %1125 = vmatpush3.bf16.msra.mxu1 %v1209_v28 }
  0x55   : > { %1092 = vmatprep.subr.bf16.mxu0 %v1201_v29  ;;  %1126 = vmatprep.subr.bf16.mxu1 %v1269_v17 }
  0x58   : > { %1093 = vmatpush3.bf16.msra.mxu0 %v1201_v29  ;;  %1127 = vmatpush3.bf16.msra.mxu1 %v1210_v30 }
  0x59   : > { %1094 = vmatprep.subr.bf16.mxu0 %v1202_v31  ;;  %1128 = vmatprep.subr.bf16.mxu1 %v1269_v17  ;;  %v445_v17 = vld [vmem:[#allocation2 + $0x68] sm:$0xff] }
  0x5c   : > { %1095 = vmatpush3.bf16.msra.mxu0 %v1202_v31  ;;  %1129 = vmatpush3.bf16.msra.mxu1 %v1211_v32 }
  0x5d   : > { %1096 = vmatprep.subr.bf16.mxu0 %v1204_v33 }
  0x5f   : > { %1131 = vmatmul.mubr.bf16.vlgmr.msra.gmra.mrb[0].mxu1 %v1271_v34 }
  0x60   : > { %1097 = vmatpush3.bf16.msra.mxu0 %v1204_v33 }
  0x63   : > { %1099 = vmatmul.mubr.bf16.vlgmr.msra.gmra.mrb[0].mxu0 %v1205_v19 }
  0x64   : > { %1102 = vmatprep.mubr.bf16.mxu0 %v1206_v22 }
  0x6b   : > { %1103 = vmatmul.mubr.bf16.gmra.mrb[4].mxu0 %v1207_v25  ;;  %v789_v25 = vlaneseq (!%p1053_p0) }
  0x6c   : > { %1106 = vmatprep.mubr.bf16.mxu0 %v1208_v26 }
  0x6d   : > { %v1449_v33 = vshrl.u32 (!%p1053_p0), %v789_v25, 7 }
  0x73   : > { %1107 = vmatmul.mubr.bf16.gmra.mrb[8].mxu0 %v1209_v28  ;;  %v1446_v28 = vstv (!%p1053_p0), %s1033_s13 }
  0x74   : > { %1110 = vmatprep.mubr.bf16.mxu0 %v1210_v30 }
  0x7b   : > { %1111 = vmatmul.mubr.bf16.gmra.mrb[12].mxu0 %v1211_v32 }
 0x132   : > { %v707_v35 = vpop.f32.mrb[0].mxu1 }
 0x133   : > { %713 = vst [vmem:[%s368_s17] sm:$0x1] %v707_v35  ;;  %v1132_v36 = vpop.f32.mrb[1].mxu1 }
 0x134   : > { %v710_v38 = vpop.f32.mrb[2].mxu1 }
 0x135   : > { %v1133_v40 = vpop.f32.mrb[3].mxu1 }
 0x136   : > { %v1100_v41 = vpop.f32.mrb[0].mxu0 }
 0x137   : > { %v643_v43 = vadd.f32 %v1100_v41, %v434_v37  ;;  %v578_v44 = vpop.f32.mrb[1].mxu0 }
 0x138   : > { %v641_v46 = vadd.f32 %v578_v44, %v432_v39  ;;  %v1101_v47 = vpop.f32.mrb[2].mxu0  ;;  %v791_v44 = vadd.s32 (!%p1053_p0), 8, %v1449_v33 }
 0x139   : > { %659 = vst [vmem:[#allocation2 + $0x10] sm:$0xff] %v643_v43  ;;  %v644_v48 = vadd.f32 %v1101_v47, %v435_v42  ;;  %v581_v49 = vpop.f32.mrb[3].mxu0  ;;  %v807_v43 = vadd.s32 (!%p1053_p0), %v1446_v28, %v1449_v33 }
 0x13a   : > { %657 = vst [vmem:[#allocation2] sm:$0xff] %v641_v46  ;;  %v642_v50 = vadd.f32 %v581_v49, %v433_v45  ;;  %v792_v46 = vadd.s32 (!%p1053_p0), 16, %v1449_v33 }
 0x13b   : > { %660 = vst [vmem:[#allocation2 + $0x18] sm:$0xff] %v644_v48  ;;  %v793_v48 = vadd.s32 (!%p1053_p0), 24, %v1449_v33  ;;  %vm823_vm1 = vcmp.lt.s32.totalorder (!%p1053_p0), %v807_v43, 192 }
 0x13c   : > { %658 = vst [vmem:[#allocation2 + $0x8] sm:$0xff] %v642_v50  ;;  %v794_v50 = vadd.s32 (!%p1053_p0), 32, %v1449_v33 }
 0x13e   : > { %v1104_v53 = vpop.f32.mrb[4].mxu0 }
 0x13f   : > { %v647_v55 = vadd.f32 %v1104_v53, %v438_v51  ;;  %v594_v56 = vpop.f32.mrb[5].mxu0  ;;  %v808_v51 = vadd.s32 (!%p1053_p0), %v1446_v28, %v791_v44 }
 0x140   : > { %v645_v58 = vadd.f32 %v594_v56, %v436_v52  ;;  %v1105_v59 = vpop.f32.mrb[6].mxu0  ;;  %v720_v30 = vld [vmem:[#allocation2 + $0x10] sm:$0xff] (!%p1053_p0)  ;;  %v809_v52 = vadd.s32 (!%p1053_p0), %v1446_v28, %v792_v46  ;;  %v811_v56 = vadd.s32 (!%p1053_p0), %v1446_v28, %v794_v50 }
 0x141   : > { %663 = vst [vmem:[#allocation2 + $0x30] sm:$0xff] %v647_v55  ;;  %v648_v60 = vadd.f32 %v1105_v59, %v439_v54  ;;  %v597_v61 = vpop.f32.mrb[7].mxu0  ;;  %v718_v23 = vld [vmem:[#allocation2] sm:$0xff] (!%p1053_p0)  ;;  %v743_v34 = vadd.f32 (!%p1053_p0), %v1441_v24, %v720_v30  ;;  %v810_v55 = vadd.s32 (!%p1053_p0), %v1446_v28, %v793_v48  ;;  %vm824_vm2 = vcmp.lt.s32.totalorder (!%p1053_p0), %v808_v51, 192 }
 0x142   : > { %661 = vst [vmem:[#allocation2 + $0x20] sm:$0xff] %v645_v58  ;;  %v646_v62 = vadd.f32 %v597_v61, %v437_v57  ;;  %v741_v27 = vadd.f32 (!%p1053_p0), %v1441_v24, %v718_v23  ;;  %v721_v31 = vld [vmem:[#allocation2 + $0x18] sm:$0xff] (!%p1053_p0)  ;;  %v795_v57 = vadd.s32 (!%p1053_p0), 40, %v1449_v33  ;;  %vm825_vm3 = vcmp.lt.s32.totalorder (!%p1053_p0), %v809_v52, 192 }
 0x143   : > { %664 = vst [vmem:[#allocation2 + $0x38] sm:$0xff] %v648_v60  ;;  %v719_v26 = vld [vmem:[#allocation2 + $0x8] sm:$0xff] (!%p1053_p0)  ;;  %v744_v35 = vadd.f32 (!%p1053_p0), %v1441_v24, %v721_v31  ;;  %v759_v45 = vmax.f32 (!%p1053_p0), %v743_v34, 0.0  ;;  %v796_v59 = vadd.s32 (!%p1053_p0), 48, %v1449_v33  ;;  %vm826_vm4 = vcmp.lt.s32.totalorder (!%p1053_p0), %v810_v55, 192 }
 0x144   : > { %662 = vst [vmem:[#allocation2 + $0x28] sm:$0xff] %v646_v62  ;;  %v742_v29 = vadd.f32 (!%p1053_p0), %v1441_v24, %v719_v26  ;;  %v757_v39 = vmax.f32 (!%p1053_p0), %v741_v27, 0.0  ;;  %vm827_vm5 = vcmp.lt.s32.totalorder (!%p1053_p0), %v811_v56, 192  ;;  %v800_v27 = vadd.s32 (!%p1053_p0), 80, %v1449_v33 }
 0x145   : > { %v760_v47 = vmax.f32 (!%p1053_p0), %v744_v35, 0.0  ;;  %775 = vst [vmem:[%s1392_s8 + $0x10] sm:$0xff] (!%p1053_p0), %v759_v45  ;;  %v803_v51 = vadd.s32 (!%p1053_p0), 104, %v1449_v33 }
 0x146   : > { %v1108_v1 = vpop.f32.mrb[8].mxu0  ;;  %v758_v40 = vmax.f32 (!%p1053_p0), %v742_v29, 0.0  ;;  %773 = vst [vmem:[%s1392_s8] sm:$0xff] (!%p1053_p0), %v757_v39  ;;  %v839_v54 = vsel (!%p1053_p0), %vm823_vm1, %v757_v39, 0.0  ;;  %v817_v35 = vadd.s32 (!%p1053_p0), %v1446_v28, %v800_v27 }
 0x147   : > { %v651_v3 = vadd.f32 %v1108_v1, %v442_v63  ;;  %v610_v4 = vpop.f32.mrb[9].mxu0  ;;  %776 = vst [vmem:[%s1392_s8 + $0x18] sm:$0xff] (!%p1053_p0), %v760_v47  ;;  %v841_v63 = vsel (!%p1053_p0), %vm825_vm3, %v759_v45, 0.0 }
 0x148   : > { %v649_v6 = vadd.f32 %v610_v4, %v440_v0  ;;  %v1109_v7 = vpop.f32.mrb[10].mxu0  ;;  %v724_v38 = vld [vmem:[#allocation2 + $0x30] sm:$0xff] (!%p1053_p0)  ;;  %774 = vst [vmem:[%s1392_s8 + $0x8] sm:$0xff] (!%p1053_p0), %v758_v40  ;;  %v840_v62 = vsel (!%p1053_p0), %vm824_vm2, %v758_v40, 0.0  ;;  %v813_v4 = vadd.s32 (!%p1053_p0), %v1446_v28, %v796_v59  ;;  %v802_v40 = vadd.s32 (!%p1053_p0), 96, %v1449_v33 }
 0x149   : > { %667 = vst [vmem:[#allocation2 + $0x50] sm:$0xff] %v651_v3  ;;  %v652_v8 = vadd.f32 %v1109_v7, %v443_v2  ;;  %v613_v9 = vpop.f32.mrb[11].mxu0  ;;  %v722_v32 = vld [vmem:[#allocation2 + $0x20] sm:$0xff] (!%p1053_p0)  ;;  %v1456_v42 = vadd.f32 (!%p1053_p0), %v1441_v24, %v724_v38  ;;  %v855_v1 = vadd.f32 (!%p1053_p0), %v840_v62, %v839_v54  ;;  %v842_v2 = vsel (!%p1053_p0), %vm826_vm4, %v760_v47, 0.0 }
 0x14a   : > { %665 = vst [vmem:[#allocation2 + $0x40] sm:$0xff] %v649_v6  ;;  %v650_v10 = vadd.f32 %v613_v9, %v441_v5  ;;  %v745_v36 = vadd.f32 (!%p1053_p0), %v1441_v24, %v722_v32  ;;  %v725_v60 = vld [vmem:[#allocation2 + $0x38] sm:$0xff] (!%p1053_p0)  ;;  %v812_v3 = vadd.s32 (!%p1053_p0), %v1446_v28, %v795_v57  ;;  %v797_v6 = vadd.s32 (!%p1053_p0), 56, %v1449_v33 }
 0x14b   : > { %668 = vst [vmem:[#allocation2 + $0x58] sm:$0xff] %v652_v8  ;;  %v723_v37 = vld [vmem:[#allocation2 + $0x28] sm:$0xff] (!%p1053_p0)  ;;  %v763_v58 = vmax.f32 (!%p1053_p0), %v1456_v42, 0.0  ;;  %v748_v5 = vadd.f32 (!%p1053_p0), %v1441_v24, %v725_v60  ;;  %v856_v8 = vadd.f32 (!%p1053_p0), %v855_v1, %v841_v63  ;;  %v798_v9 = vadd.s32 (!%p1053_p0), 64, %v1449_v33 }
 0x14c   : > { %666 = vst [vmem:[#allocation2 + $0x48] sm:$0xff] %v650_v10  ;;  %v746_v41 = vadd.f32 (!%p1053_p0), %v1441_v24, %v723_v37  ;;  %v761_v49 = vmax.f32 (!%p1053_p0), %v745_v36, 0.0  ;;  %vm828_vm6 = vcmp.lt.s32.totalorder (!%p1053_p0), %v812_v3, 192  ;;  %vm829_vm7 = vcmp.lt.s32.totalorder (!%p1053_p0), %v813_v4, 192 }
 0x14d   : > { %779 = vst [vmem:[%s1392_s8 + $0x30] sm:$0xff] (!%p1053_p0), %v763_v58  ;;  %v845_v26 = vsel (!%p1053_p0), %vm829_vm7, %v763_v58, 0.0  ;;  %v801_v36 = vadd.s32 (!%p1053_p0), 88, %v1449_v33  ;;  %vm833_vm11 = vcmp.lt.s32.totalorder (!%p1053_p0), %v817_v35, 192  ;;  %v819_v50 = vadd.s32 (!%p1053_p0), %v1446_v28, %v802_v40 }
 0x14e   : > { %v1112_v13 = vpop.f32.mrb[12].mxu0  ;;  %717 = sbr.rel (%p1053_p0) target bundleno = 376 (0x178), region = 81  ;;  %v762_v53 = vmax.f32 (!%p1053_p0), %v746_v41, 0.0  ;;  %777 = vst [vmem:[%s1392_s8 + $0x20] sm:$0xff] (!%p1053_p0), %v761_v49  ;;  %v804_v54 = vadd.s32 (!%p1053_p0), 112, %v1449_v33  ;;  %v820_v57 = vadd.s32 (!%p1053_p0), %v1446_v28, %v803_v51 }
 0x14f   : > { %v655_v15 = vadd.f32 %v1112_v13, %v446_v11  ;;  %v626_v16 = vpop.f32.mrb[13].mxu0  ;;  %v764_v13 = vmax.f32 (!%p1053_p0), %v748_v5, 0.0  ;;  %v818_v44 = vadd.s32 (!%p1053_p0), %v1446_v28, %v801_v36  ;;  %vm835_vm13 = vcmp.lt.s32.totalorder (!%p1053_p0), %v819_v50, 192 }
 0x150   : > { %v653_v18 = vadd.f32 %v626_v16, %v444_v12  ;;  %v1113_v19 = vpop.f32.mrb[14].mxu0  ;;  %778 = vst [vmem:[%s1392_s8 + $0x28] sm:$0xff] (!%p1053_p0), %v762_v53  ;;  %v728_v11 = vld [vmem:[#allocation2 + $0x50] sm:$0xff] (!%p1053_p0)  ;;  %v843_v12 = vsel (!%p1053_p0), %vm827_vm5, %v761_v49, 0.0  ;;  %v821_v63 = vadd.s32 (!%p1053_p0), %v1446_v28, %v804_v54  ;;  %vm836_vm14 = vcmp.lt.s32.totalorder (!%p1053_p0), %v820_v57, 192 }
 0x151   : > { %671 = vst [vmem:[#allocation2 + $0x70] sm:$0xff] %v655_v15  ;;  %v656_v20 = vadd.f32 %v1113_v19, %v447_v14  ;;  %v629_v21 = vpop.f32.mrb[15].mxu0  ;;  %v726_v61 = vld [vmem:[#allocation2 + $0x40] sm:$0xff] (!%p1053_p0)  ;;  %v814_v14 = vadd.s32 (!%p1053_p0), %v1446_v28, %v797_v6  ;;  %v857_v15 = vadd.f32 (!%p1053_p0), %v856_v8, %v842_v2  ;;  %v844_v19 = vsel (!%p1053_p0), %vm828_vm6, %v762_v53, 0.0  ;;  %780 = vst [vmem:[%s1392_s8 + $0x38] sm:$0xff] (!%p1053_p0), %v764_v13 }
 0x152   : > { %669 = vst [vmem:[#allocation2 + $0x60] sm:$0xff] %v653_v18  ;;  %v654_v22 = vadd.f32 %v629_v21, %v445_v17  ;;  %v749_v7 = vadd.f32 (!%p1053_p0), %v1441_v24, %v726_v61  ;;  %v815_v17 = vadd.s32 (!%p1053_p0), %v1446_v28, %v798_v9  ;;  %v729_v18 = vld [vmem:[#allocation2 + $0x58] sm:$0xff] (!%p1053_p0)  ;;  %v799_v21 = vadd.s32 (!%p1053_p0), 72, %v1449_v33 }
 0x153   : > { %672 = vst [vmem:[#allocation2 + $0x78] sm:$0xff] %v656_v20  ;;  %v727_v0 = vld [vmem:[#allocation2 + $0x48] sm:$0xff] (!%p1053_p0)  ;;  %v858_v25 = vadd.f32 (!%p1053_p0), %v857_v15, %v843_v12  ;;  %vm830_vm8 = vcmp.lt.s32.totalorder (!%p1053_p0), %v814_v14, 192  ;;  %v752_v32 = vadd.f32 (!%p1053_p0), %v1441_v24, %v729_v18  ;;  %vm834_vm12 = vcmp.lt.s32.totalorder (!%p1053_p0), %v818_v44, 192 }
 0x154   : > { %670 = vst [vmem:[#allocation2 + $0x68] sm:$0xff] %v654_v22  ;;  %v750_v10 = vadd.f32 (!%p1053_p0), %v1441_v24, %v727_v0  ;;  %v765_v16 = vmax.f32 (!%p1053_p0), %v749_v7, 0.0  ;;  %v751_v22 = vadd.f32 (!%p1053_p0), %v1441_v24, %v728_v11  ;;  %vm831_vm9 = vcmp.lt.s32.totalorder (!%p1053_p0), %v815_v17, 192 }
 0x155   : > { %v816_v30 = vadd.s32 %v1446_v28, %v799_v21  ;;  %v859_v34 = vadd.f32 %v858_v25, %v844_v19  ;;  %v846_v38 = vsel %vm830_vm8, %v764_v13, 0.0  ;;  %v768_v39 = vmax.f32 %v752_v32, 0.0 }
 0x156   : > { %v766_v20 = vmax.f32 %v750_v10, 0.0  ;;  %781 = vst [vmem:[%s1392_s8 + $0x40] sm:$0xff] %v765_v16  ;;  %v767_v31 = vmax.f32 %v751_v22, 0.0  ;;  %v847_v46 = vsel %vm831_vm9, %v765_v16, 0.0  ;;  %v805_v61 = vadd.s32 120, %v1449_v33 }
 0x157   : > { %v860_v43 = vadd.f32 %v859_v34, %v845_v26  ;;  %vm832_vm10 = vcmp.lt.s32.totalorder %v816_v30, 192  ;;  %784 = vst [vmem:[%s1392_s8 + $0x58] sm:$0xff] %v768_v39  ;;  %v850_v0 = vsel %vm834_vm12, %v768_v39, 0.0  ;;  %vm837_vm15 = vcmp.lt.s32.totalorder %v821_v63, 192 }
 0x158   : > { %782 = vst [vmem:[%s1392_s8 + $0x48] sm:$0xff] %v766_v20  ;;  %783 = vst [vmem:[%s1392_s8 + $0x50] sm:$0xff] %v767_v31  ;;  %v732_v42 = vld [vmem:[#allocation2 + $0x70] sm:$0xff]  ;;  %v848_v53 = vsel %vm832_vm10, %v766_v20, 0.0  ;;  %v849_v59 = vsel %vm833_vm11, %v767_v31, 0.0 }
 0x159   : > { %v730_v23 = vld [vmem:[#allocation2 + $0x60] sm:$0xff]  ;;  %v861_v49 = vadd.f32 %v860_v43, %v846_v38  ;;  %v755_v52 = vadd.f32 %v1441_v24, %v732_v42 }
 0x15a   : > { %v753_v37 = vadd.f32 %v1441_v24, %v730_v23  ;;  %v733_v45 = vld [vmem:[#allocation2 + $0x78] sm:$0xff] }
 0x15b   : > { %v731_v29 = vld [vmem:[#allocation2 + $0x68] sm:$0xff]  ;;  %v756_v55 = vadd.f32 %v1441_v24, %v733_v45  ;;  %v862_v56 = vadd.f32 %v861_v49, %v847_v46  ;;  %v771_v58 = vmax.f32 %v755_v52, 0.0 }
 0x15c   : > { %v754_v41 = vadd.f32 %v1441_v24, %v731_v29  ;;  %v769_v47 = vmax.f32 %v753_v37, 0.0  ;;  %v822_v24 = vadd.s32 %v1446_v28, %v805_v61 }
 0x15d   : > { %v772_v60 = vmax.f32 %v756_v55, 0.0  ;;  %v863_v62 = vadd.f32 %v862_v56, %v848_v53  ;;  %787 = vst [vmem:[%s1392_s8 + $0x70] sm:$0xff] %v771_v58  ;;  %v853_v6 = vsel %vm837_vm15, %v771_v58, 0.0 }
 0x15e   : > { %v770_v48 = vmax.f32 %v754_v41, 0.0  ;;  %785 = vst [vmem:[%s1392_s8 + $0x60] sm:$0xff] %v769_v47  ;;  %v851_v2 = vsel %vm835_vm13, %v769_v47, 0.0  ;;  %vm838_vm0 = vcmp.lt.s32.totalorder %v822_v24, 192 }
 0x15f   : > { %788 = vst [vmem:[%s1392_s8 + $0x78] sm:$0xff] %v772_v60  ;;  %v864_v1 = vadd.f32 %v863_v62, %v849_v59  ;;  %v854_v7 = vsel %vm838_vm0, %v772_v60, 0.0 }
 0x160   : > { %786 = vst [vmem:[%s1392_s8 + $0x68] sm:$0xff] %v770_v48  ;;  %v852_v4 = vsel %vm836_vm14, %v770_v48, 0.0 }
 0x161   : > { %v865_v3 = vadd.f32 %v864_v1, %v850_v0 }
 0x163   : > { %v866_v5 = vadd.f32 %v865_v3, %v851_v2 }
 0x165   : > { %v867_v33 = vadd.f32 %v866_v5, %v852_v4 }
 0x167   : > { %v868_v8 = vadd.f32 %v867_v33, %v853_v6 }
 0x169   : > { %v869_v9 = vadd.f32 %v868_v8, %v854_v7 }
 0x16b   : > { %v870_v10 = vrot.slane %v869_v9, 4 }
 0x16d   : > { %v871_v11 = vadd.f32 %v870_v10, %v869_v9 }
 0x16f   : > { %v872_v12 = vrot.slane %v871_v11, 2 }
 0x171   : > { %v873_v13 = vadd.f32 %v872_v12, %v871_v11 }
 0x173   : > { %v874_v14 = vrot.slane %v873_v13, 1 }
 0x175   : > { %v875_v15 = vadd.f32 %v874_v14, %v873_v13 }
 0x177   : > { %876 = vst [vmem:[%s371_s12] sm:$0x1] %v875_v15 }
 0x178 PF: > { %s16_s24 = sadd.s32 1, %s1266_s24   ;;  %s1552_s18 = smov %s1246_s19 }
 0x179   : > { %p13_p1 = scmp.ge.s32.totalorder %s16_s24, 8   ;;  %s1553_s19 = smov %s1353_s6 }
 0x17a   : > { %s1554_s20 = smov %s1258_s22  ;;  %s1555_s21 = smov %s1262_s23 }
 0x17b   : > { %s1556_s22 = smov %s1559_s25  ;;  %s1557_s23 = smov %s1563_s26 }
 0x17c   :  { %15 = sbr.rel (!%p13_p1) target bundleno = 6 (0x6), region = 141 }

// kernel: adap_gconv.3
= control target key start
LH: loop header
LB: loop body
LE: loop exit
PB: predicated region body
PF: predicated region fallthrough
CT: control target
= control target key end

     0   :  { %s1064_s18 = smov 0   ;;  %s1209_s0 = inlined_call_operand.vmem [shape: bf16[384,128], index: 0, kind: input, shape index: {}]   ;;  %s1210_s1 = inlined_call_operand.vmem [shape: bf16[128,128], index: 1, kind: input, shape index: {}]   ;;  %s1211_s2 = inlined_call_operand.vmem [shape: f32[384,1], index: 2, kind: input, shape index: {}]   ;;  %s1212_s3 = inlined_call_operand.vmem [shape: f32[1,128], index: 3, kind: input, shape index: {}]   ;;  %s1213_s4 = inlined_call_operand.vmem [shape: bf16[384,128], index: 4, kind: output, shape index: {0}]   ;;  %s1214_s5 = inlined_call_operand.vmem [shape: f32[384,128], index: 5, kind: output, shape index: {1}]  }
   0x1 LB: > { %s823_s19 = sadd.s32 4294967295, %s1031_s18   ;;  %p827_p0 = scmp.ge.s32.totalorder %s1031_s18, 1  ;;  %s1031_s18 = sphi %s1064_s18, %s16_s18  }
   0x2   : > { %p202_p1 = scmp.lt.s32.totalorder %s1031_s18, 4 }
   0x4   : > { %p203_p2 = pnand %p827_p0, %p202_p1 }
   0x5   : > { %v1009_v0 = vld [vmem:[%s1210_s1] sm:$0xff] (!%p203_p2)   ;;  %s828_s22 = sshll.u32 (!%p203_p2), %s823_s19, 4  ;;  %v1010_v1 = vld [vmem:[%s1210_s1 + $0x8] sm:$0xff] (!%p203_p2)   ;;  %v1011_v2 = vld [vmem:[%s1210_s1 + $0x10] sm:$0xff] (!%p203_p2)   ;;  %v1033_v3 = vmov (!%p203_p2), 0  }
   0x6   : > { %206 = sbr.rel (%p203_p2) target bundleno = 267 (0x10b), region = 36  ;;  %p241_p3 = scmp.lt.s32.totalorder (!%p203_p2), %s828_s22, 47  ;;  %950 = vmatprep.subr.bf16.mxu0 (!%p203_p2), %v1009_v0  ;;  %982 = vmatprep.subr.bf16.mxu1 (!%p203_p2), %v1009_v0  ;;  %v1012_v4 = vld [vmem:[%s1210_s1 + $0x18] sm:$0xff] (!%p203_p2)   ;;  %v1013_v7 = vld [vmem:[%s1210_s1 + $0x20] sm:$0xff] (!%p203_p2)   ;;  %v1014_v8 = vld [vmem:[%s1210_s1 + $0x28] sm:$0xff] (!%p203_p2)  }
   0x7   : > { %951 = vmatpush3.bf16.msra.mxu0 (!%p203_p2), %v1009_v0  ;;  %990 = vmatpush3.bf16.msra.mxu1 (!%p203_p2), %v1009_v0  ;;  %v1015_v13 = vld [vmem:[%s1210_s1 + $0x30] sm:$0xff] (!%p203_p2)   ;;  %v1016_v16 = vld [vmem:[%s1210_s1 + $0x38] sm:$0xff] (!%p203_p2)   ;;  %v1145_v45 = vld [vmem:[%s1212_s3] ss:$0 sm:$0xff] (!%p203_p2) }
   0x8   : > { %952 = vmatprep.subr.bf16.mxu0 (!%p203_p2), %v1010_v1  ;;  %983 = vmatprep.subr.bf16.mxu1 (!%p203_p2), %v1010_v1 }
   0x9   : > { %1008 = vset.pattern.permute.xlu1 (!%p203_p2), %v1033_v3  ;;  %1007 = vset.pattern.permute.xlu0 (!%p203_p2), %v1033_v3 }
   0xb   : > { %953 = vmatpush3.bf16.msra.mxu0 (!%p203_p2), %v1010_v1  ;;  %991 = vmatpush3.bf16.msra.mxu1 (!%p203_p2), %v1010_v1 }
   0xc   : > { %954 = vmatprep.subr.bf16.mxu0 (!%p203_p2), %v1011_v2  ;;  %984 = vmatprep.subr.bf16.mxu1 (!%p203_p2), %v1011_v2 }
   0xd   : > { %s1216_s22 = smov (!%p241_p3, %s828_s22), 47 }
   0xe   : > { %s829_s27 = sshll.u32 %s1216_s22, 2  ;;  %s831_s8 = sshll.u32 %s1216_s22, 3 }
   0xf   : > { %s1089_s30 = scalar_lea.vmem %s1209_s0, %s829_s27  ;;  %955 = vmatpush3.bf16.msra.mxu0 %v1011_v2  ;;  %992 = vmatpush3.bf16.msra.mxu1 %v1011_v2  ;;  %s1105_s13 = scalar_lea.vmem %s1211_s2, %s831_s8 }
  0x10   : > { %v1017_v5 = vld [vmem:[%s1089_s30] sm:$0xff]   ;;  %956 = vmatprep.subr.bf16.mxu0 %v1012_v4  ;;  %985 = vmatprep.subr.bf16.mxu1 %v1012_v4  ;;  %v492_v9 = vld [vmem:[%s1105_s13 + $0x10] sm:$0xff]  ;;  %v493_v11 = vld [vmem:[%s1105_s13 + $0x18] sm:$0xff]  ;;  %s1154_s26 = scalar_lea.vmem %s1214_s5, %s831_s8 }
  0x11   : > { %v1018_v6 = vld [vmem:[%s1089_s30 + $0x20] sm:$0xff]   ;;  %966 = vmatprep.mubr.bf16.mxu0 %v1017_v5  ;;  %518 = vperm.xlu1 %1008, %v492_v9   ;;  %v491_v12 = vld [vmem:[%s1105_s13 + $0x8] sm:$0xff]  ;;  %v497_v17 = vld [vmem:[%s1105_s13 + $0x38] sm:$0xff] }
  0x12   : > { %974 = vmatprep.mubr.bf16.mxu1 %v1018_v6  ;;  %v490_v10 = vld [vmem:[%s1105_s13] sm:$0xff]  ;;  %v495_v14 = vld [vmem:[%s1105_s13 + $0x28] sm:$0xff]  ;;  %v496_v18 = vld [vmem:[%s1105_s13 + $0x30] sm:$0xff] }
  0x13   : > { %957 = vmatpush3.bf16.msra.mxu0 %v1012_v4  ;;  %993 = vmatpush3.bf16.msra.mxu1 %v1012_v4  ;;  %v494_v15 = vld [vmem:[%s1105_s13 + $0x20] sm:$0xff]  ;;  %v1019_v19 = vld [vmem:[%s1089_s30 + $0x8] sm:$0xff]   ;;  %v1021_v23 = vld [vmem:[%s1089_s30 + $0x10] sm:$0xff]  }
  0x14   : > { %958 = vmatprep.subr.bf16.mxu0 %v1013_v7  ;;  %986 = vmatprep.subr.bf16.mxu1 %v1013_v7  ;;  %v1020_v20 = vld [vmem:[%s1089_s30 + $0x28] sm:$0xff]   ;;  %v498_v22 = vld [vmem:[%s1105_s13 + $0x40] sm:$0xff]  ;;  %v1022_v24 = vld [vmem:[%s1089_s30 + $0x30] sm:$0xff]  }
  0x15   : > { %508 = vperm.xlu0 %1007, %v490_v10   ;;  %523 = vperm.xlu1 %1008, %v493_v11   ;;  %v499_v21 = vld [vmem:[%s1105_s13 + $0x48] sm:$0xff]  ;;  %v501_v25 = vld [vmem:[%s1105_s13 + $0x58] sm:$0xff]  ;;  %v500_v26 = vld [vmem:[%s1105_s13 + $0x50] sm:$0xff] }
  0x16   : > { %v1023_v27 = vld [vmem:[%s1089_s30 + $0x18] sm:$0xff]   ;;  %v503_v29 = vld [vmem:[%s1105_s13 + $0x68] sm:$0xff]  ;;  %v502_v30 = vld [vmem:[%s1105_s13 + $0x60] sm:$0xff] }
  0x17   : > { %959 = vmatpush3.bf16.msra.mxu0 %v1013_v7  ;;  %994 = vmatpush3.bf16.msra.mxu1 %v1013_v7  ;;  %v1024_v28 = vld [vmem:[%s1089_s30 + $0x38] sm:$0xff]   ;;  %v504_v32 = vld [vmem:[%s1105_s13 + $0x70] sm:$0xff]  ;;  %s1171_s30 = scalar_lea.vmem %s1213_s4, %s829_s27 }
  0x18   : > { %960 = vmatprep.subr.bf16.mxu0 %v1014_v8  ;;  %987 = vmatprep.subr.bf16.mxu1 %v1014_v8  ;;  %v505_v31 = vld [vmem:[%s1105_s13 + $0x78] sm:$0xff] }
  0x19   : > { %513 = vperm.xlu0 %1007, %v491_v12   ;;  %533 = vperm.xlu1 %1008, %v495_v14  }
  0x1b   : > { %961 = vmatpush3.bf16.msra.mxu0 %v1014_v8  ;;  %995 = vmatpush3.bf16.msra.mxu1 %v1014_v8 }
  0x1c   : > { %962 = vmatprep.subr.bf16.mxu0 %v1015_v13  ;;  %988 = vmatprep.subr.bf16.mxu1 %v1015_v13 }
  0x1d   : > { %528 = vperm.xlu0 %1007, %v494_v15   ;;  %543 = vperm.xlu1 %1008, %v497_v17  }
  0x1f   : > { %963 = vmatpush3.bf16.msra.mxu0 %v1015_v13  ;;  %996 = vmatpush3.bf16.msra.mxu1 %v1015_v13 }
  0x20   : > { %964 = vmatprep.subr.bf16.mxu0 %v1016_v16  ;;  %989 = vmatprep.subr.bf16.mxu1 %v1016_v16 }
  0x21   : > { %538 = vperm.xlu0 %1007, %v496_v18   ;;  %553 = vperm.xlu1 %1008, %v499_v21  }
  0x23   : > { %965 = vmatpush3.bf16.msra.mxu0 %v1016_v16  ;;  %997 = vmatpush3.bf16.msra.mxu1 %v1016_v16 }
  0x25   : > { %548 = vperm.xlu0 %1007, %v498_v22   ;;  %563 = vperm.xlu1 %1008, %v501_v25  }
  0x26   : > { %967 = vmatmul.mubr.bf16.vlgmr.msra.gmra.mrb[0].mxu0 %v1019_v19  ;;  %975 = vmatmul.mubr.bf16.vlgmr.msra.gmra.mrb[0].mxu1 %v1020_v20 }
  0x27   : > { %970 = vmatprep.mubr.bf16.mxu0 %v1021_v23  ;;  %978 = vmatprep.mubr.bf16.mxu1 %v1022_v24 }
  0x29   : > { %558 = vperm.xlu0 %1007, %v500_v26   ;;  %573 = vperm.xlu1 %1008, %v503_v29  }
  0x2d   : > { %568 = vperm.xlu0 %1007, %v502_v30   ;;  %583 = vperm.xlu1 %1008, %v505_v31  }
  0x2e   : > { %971 = vmatmul.mubr.bf16.gmra.mrb[4].mxu0 %v1023_v27  ;;  %979 = vmatmul.mubr.bf16.gmra.mrb[4].mxu1 %v1024_v28 }
  0x31   : > { %578 = vperm.xlu0 %1007, %v504_v32  }
  0x90   : > { %v519_v33 = vpop.permute.xlu1 %518 }
  0x94   : > { %v509_v34 = vpop.permute.xlu0 %508  ;;  %v524_v35 = vpop.permute.xlu1 %523 }
  0x98   : > { %v514_v36 = vpop.permute.xlu0 %513  ;;  %v1138_v37 = vpop.permute.xlu1 %533 }
  0x9c   : > { %v529_v38 = vpop.permute.xlu0 %528  ;;  %v1140_v39 = vpop.permute.xlu1 %543 }
  0xa0   : > { %v539_v40 = vpop.permute.xlu0 %538  ;;  %v554_v41 = vpop.permute.xlu1 %553 }
  0xa4   : > { %v549_v42 = vpop.permute.xlu0 %548  ;;  %v564_v43 = vpop.permute.xlu1 %563 }
  0xa8   : > { %v559_v44 = vpop.permute.xlu0 %558  ;;  %v1147_v46 = vpop.permute.xlu1 %573 }
  0xac   : > { %v569_v47 = vpop.permute.xlu0 %568  ;;  %v584_v12 = vpop.permute.xlu1 %583 }
  0xb0   : > { %v579_v13 = vpop.permute.xlu0 %578 }
  0xf9   : > { %v968_v48 = vpop.f32.mrb[0].mxu0  ;;  %v976_v49 = vpop.f32.mrb[0].mxu1 }
  0xfa   : > { %v588_v50 = vmul.f32 %v968_v48, %v519_v33  ;;  %v691_v51 = vadd.f32 %v968_v48, %v1145_v45  ;;  %v596_v52 = vmul.f32 %v976_v49, %v559_v44  ;;  %v699_v53 = vadd.f32 %v976_v49, %v1145_v45  ;;  %v427_v54 = vpop.f32.mrb[1].mxu0  ;;  %v459_v55 = vpop.f32.mrb[1].mxu1 }
  0xfb   : > { %v586_v56 = vmul.f32 %v509_v34, %v427_v54  ;;  %v689_v57 = vadd.f32 %v1145_v45, %v427_v54  ;;  %v594_v58 = vmul.f32 %v549_v42, %v459_v55  ;;  %v697_v59 = vadd.f32 %v1145_v45, %v459_v55  ;;  %v969_v60 = vpop.f32.mrb[2].mxu0  ;;  %v977_v61 = vpop.f32.mrb[2].mxu1 }
  0xfc   : > { %707 = vst [vmem:[%s1154_s26 + $0x10] sm:$0xff] %v691_v51  ;;  %715 = vst [vmem:[%s1154_s26 + $0x50] sm:$0xff] %v699_v53  ;;  %v589_v62 = vmul.f32 %v969_v60, %v524_v35  ;;  %v692_v63 = vadd.f32 %v969_v60, %v1145_v45  ;;  %v597_v0 = vmul.f32 %v977_v61, %v564_v43  ;;  %v430_v2 = vpop.f32.mrb[3].mxu0  ;;  %v462_v3 = vpop.f32.mrb[3].mxu1 }
  0xfd   : > { %v700_v1 = vadd.f32 %v977_v61, %v1145_v45  ;;  %705 = vst [vmem:[%s1154_s26] sm:$0xff] %v689_v57  ;;  %713 = vst [vmem:[%s1154_s26 + $0x40] sm:$0xff] %v697_v59  ;;  %v587_v4 = vmul.f32 %v514_v36, %v430_v2  ;;  %v690_v5 = vadd.f32 %v1145_v45, %v430_v2 }
  0xfe   : > { %v595_v6 = vmul.f32 %v554_v41, %v462_v3  ;;  %v698_v7 = vadd.f32 %v1145_v45, %v462_v3  ;;  %v895_v8 = vpack.c.bf16 %v589_v62, %v588_v50  ;;  %708 = vst [vmem:[%s1154_s26 + $0x18] sm:$0xff] %v692_v63  ;;  %v915_v9 = vpack.c.bf16 %v597_v0, %v596_v52 }
  0xff   : > { %716 = vst [vmem:[%s1154_s26 + $0x58] sm:$0xff] %v700_v1  ;;  %v890_v10 = vpack.c.bf16 %v587_v4, %v586_v56  ;;  %706 = vst [vmem:[%s1154_s26 + $0x8] sm:$0xff] %v690_v5 }
 0x100   : > { %v910_v11 = vpack.c.bf16 %v595_v6, %v594_v58  ;;  %714 = vst [vmem:[%s1154_s26 + $0x48] sm:$0xff] %v698_v7  ;;  %927 = vst [vmem:[%s1171_s30 + $0x8] sm:$0xff] %v895_v8  }
 0x101   : > { %931 = vst [vmem:[%s1171_s30 + $0x28] sm:$0xff] %v915_v9   ;;  %891 = vst [vmem:[%s1171_s30] sm:$0xff] %v890_v10   ;;  %v972_v14 = vpop.f32.mrb[4].mxu0  ;;  %v980_v15 = vpop.f32.mrb[4].mxu1 }
 0x102   : > { %930 = vst [vmem:[%s1171_s30 + $0x20] sm:$0xff] %v910_v11   ;;  %v592_v16 = vmul.f32 %v972_v14, %v539_v40  ;;  %v695_v17 = vadd.f32 %v972_v14, %v1145_v45  ;;  %v600_v18 = vmul.f32 %v980_v15, %v579_v13  ;;  %v703_v19 = vadd.f32 %v980_v15, %v1145_v45  ;;  %v443_v20 = vpop.f32.mrb[5].mxu0  ;;  %v475_v21 = vpop.f32.mrb[5].mxu1 }
 0x103   : > { %v590_v22 = vmul.f32 %v529_v38, %v443_v20  ;;  %v693_v23 = vadd.f32 %v1145_v45, %v443_v20  ;;  %v598_v24 = vmul.f32 %v569_v47, %v475_v21  ;;  %v701_v25 = vadd.f32 %v1145_v45, %v475_v21  ;;  %v973_v26 = vpop.f32.mrb[6].mxu0  ;;  %v981_v27 = vpop.f32.mrb[6].mxu1 }
 0x104   : > { %711 = vst [vmem:[%s1154_s26 + $0x30] sm:$0xff] %v695_v17  ;;  %719 = vst [vmem:[%s1154_s26 + $0x70] sm:$0xff] %v703_v19  ;;  %v593_v28 = vmul.f32 %v973_v26, %v1140_v39  ;;  %v696_v29 = vadd.f32 %v973_v26, %v1145_v45  ;;  %v601_v30 = vmul.f32 %v981_v27, %v584_v12  ;;  %v446_v32 = vpop.f32.mrb[7].mxu0  ;;  %v478_v33 = vpop.f32.mrb[7].mxu1 }
 0x105   : > { %v704_v31 = vadd.f32 %v981_v27, %v1145_v45  ;;  %709 = vst [vmem:[%s1154_s26 + $0x20] sm:$0xff] %v693_v23  ;;  %717 = vst [vmem:[%s1154_s26 + $0x60] sm:$0xff] %v701_v25  ;;  %v591_v34 = vmul.f32 %v1138_v37, %v446_v32  ;;  %v694_v35 = vadd.f32 %v1145_v45, %v446_v32 }
 0x106   : > { %v599_v36 = vmul.f32 %v1147_v46, %v478_v33  ;;  %v702_v38 = vadd.f32 %v1145_v45, %v478_v33  ;;  %v905_v39 = vpack.c.bf16 %v593_v28, %v592_v16  ;;  %712 = vst [vmem:[%s1154_s26 + $0x38] sm:$0xff] %v696_v29  ;;  %v925_v40 = vpack.c.bf16 %v601_v30, %v600_v18 }
 0x107   : > { %720 = vst [vmem:[%s1154_s26 + $0x78] sm:$0xff] %v704_v31  ;;  %v900_v41 = vpack.c.bf16 %v591_v34, %v590_v22  ;;  %710 = vst [vmem:[%s1154_s26 + $0x28] sm:$0xff] %v694_v35 }
 0x108   : > { %v920_v42 = vpack.c.bf16 %v599_v36, %v598_v24  ;;  %718 = vst [vmem:[%s1154_s26 + $0x68] sm:$0xff] %v702_v38  ;;  %929 = vst [vmem:[%s1171_s30 + $0x18] sm:$0xff] %v905_v39  }
 0x109   : > { %933 = vst [vmem:[%s1171_s30 + $0x38] sm:$0xff] %v925_v40   ;;  %928 = vst [vmem:[%s1171_s30 + $0x10] sm:$0xff] %v900_v41  }
 0x10a   : > { %932 = vst [vmem:[%s1171_s30 + $0x30] sm:$0xff] %v920_v42  }
 0x10b PF: > { %s16_s18 = sadd.s32 1, %s1031_s18  }
 0x10c   : > { %p13_p4 = scmp.ge.s32.totalorder %s16_s18, 5  }
 0x10e   :  { %15 = sbr.rel (!%p13_p4) target bundleno = 1 (0x1), region = 81 }

// kernel: adap_gconv.5
= control target key start
LH: loop header
LB: loop body
LE: loop exit
PB: predicated region body
PF: predicated region fallthrough
CT: control target
= control target key end

     0   :  { %8 = vsyncpa [#allocation5], 0  ;;  %s687_s12 = smov 0   ;;  %s781_s0 = inlined_call_operand.vmem [shape: f32[1,384], index: 0, kind: input, shape index: {}]   ;;  %s782_s1 = inlined_call_operand.vmem [shape: f32[384,128], index: 1, kind: input, shape index: {}]   ;;  %s783_s2 = inlined_call_operand.vmem [shape: f32[1,128], index: 2, kind: input, shape index: {}]   ;;  %s784_s3 = inlined_call_operand.hbm [shape: f32[1,1], index: 3, kind: output, shape index: {}]  }
   0x1 LB: > { %s693_s13 = sadd.s32 4294967295, %s660_s12   ;;  %p443_p0 = scmp.ge.s32.totalorder %s660_s12, 1  ;;  %s660_s12 = sphi %s687_s12, %s14_s12  }
   0x2   : > { %p142_p1 = scmp.lt.s32.totalorder %s660_s12, 4 }
   0x4   : > { %p143_p2 = pnand %p443_p0, %p142_p1 }
   0x5   : > { %p164_p3 = scmp.lt.s32.totalorder (!%p143_p2), %s693_s13, 2  ;;  %s444_s14 = sshll.u32 (!%p143_p2), %s693_s13, 4 }
   0x6   : > { %146 = sbr.rel (%p143_p2) target bundleno = 454 (0x1c6), region = 32  ;;  %p168_p4 = scmp.lt.s32.totalorder (!%p143_p2), %s444_s14, 47 }
   0x7   : > { %p446_p5 = scmp.ne.s32.totalorder (!%p143_p2), %s693_s13, 0 }
   0xd   : > { %s700_s15 = scalar_select %p164_p3, %s693_s13, 2 }
   0xe   : > { %s786_s14 = smov (!%p168_p4, %s444_s14), 47  ;;  %176 = sbr.rel (%p446_p5) target bundleno = 21 (0x15), region = 36 }
   0xf   : > { %s166_s18 = scalar_lea.vmem %s781_s0, %s700_s15  ;;  %s445_s19 = sshll.u32 %s786_s14, 3  ;;  %v662_v0 = vmov (!%p446_p5), 0.0  }
  0x10   : > { %s709_s22 = scalar_lea.vmem %s782_s1, %s445_s19  ;;  %177 = vst [vmem:[#allocation2] sm:$0xff] (!%p446_p5), %v662_v0  ;;  %178 = vst [vmem:[#allocation3] sm:$0xff] (!%p446_p5), %v662_v0 }
  0x15 PF: > { %v186_v1 = vld [vmem:[%s709_s22] sm:$0xff]  ;;  %v187_v2 = vld [vmem:[%s709_s22 + $0x8] sm:$0xff]  ;;  %v188_v3 = vld [vmem:[%s709_s22 + $0x10] sm:$0xff]  ;;  %v663_v4 = vmov 0.0|0.0   ;;  %vm664_vm0 = vmmov 0   ;;  %v665_v13 = vmov 0.0  }
  0x16   : > { %557 = vmatprep.subr.bf16.mxu0 %v663_v4  ;;  %v558_v5 = vpack.c.bf16 %v187_v2, %v186_v1  ;;  %581 = vmatprep.subr.bf16.mxu1 %v663_v4  ;;  %v277_v6 = vmul.f32 %v186_v1, %v186_v1  ;;  %v278_v7 = vmul.f32 %v187_v2, %v187_v2  ;;  %v189_v8 = vld [vmem:[%s709_s22 + $0x18] sm:$0xff]  ;;  %v190_v11 = vld [vmem:[%s709_s22 + $0x20] sm:$0xff]  ;;  %v191_v12 = vld [vmem:[%s709_s22 + $0x28] sm:$0xff]  ;;  %p448_p6 = scmp.ne.s32.totalorder %s693_s13, 2 }
  0x17   : > { %v279_v9 = vmul.f32 %v188_v3, %v188_v3  ;;  %v280_v10 = vmul.f32 %v189_v8, %v189_v8  ;;  %519 = vmatprep.mubr.msk.f32.mxu0 %vm664_vm0, %v665_v13  ;;  %v561_v15 = vpack.c.bf16 %v189_v8, %v188_v3  ;;  %v281_v17 = vmul.f32 %v190_v11, %v190_v11  ;;  %v192_v19 = vld [vmem:[%s709_s22 + $0x30] sm:$0xff]  ;;  %v193_v20 = vld [vmem:[%s709_s22 + $0x38] sm:$0xff]  ;;  %v194_v25 = vld [vmem:[%s709_s22 + $0x40] sm:$0xff] }
  0x18   : > { %559 = vmatpush3.bf16.msra.mxu0 %v558_v5  ;;  %v582_v14 = vpack.c.bf16 %v278_v7, %v277_v6  ;;  %v282_v18 = vmul.f32 %v191_v12, %v191_v12  ;;  %v564_v21 = vpack.c.bf16 %v191_v12, %v190_v11  ;;  %v283_v23 = vmul.f32 %v192_v19, %v192_v19  ;;  %v195_v26 = vld [vmem:[%s709_s22 + $0x48] sm:$0xff]  ;;  %v196_v31 = vld [vmem:[%s709_s22 + $0x50] sm:$0xff]  ;;  %v197_v32 = vld [vmem:[%s709_s22 + $0x58] sm:$0xff] }
  0x19   : > { %560 = vmatprep.subr.bf16.mxu0 %v663_v4  ;;  %v585_v16 = vpack.c.bf16 %v280_v10, %v279_v9  ;;  %v284_v24 = vmul.f32 %v193_v20, %v193_v20  ;;  %554 = vmatprep.mubr.msk.f32.mxu1 %vm664_vm0, %v665_v13  ;;  %v567_v27 = vpack.c.bf16 %v193_v20, %v192_v19  ;;  %v198_v37 = vld [vmem:[%s709_s22 + $0x60] sm:$0xff]  ;;  %v199_v38 = vld [vmem:[%s709_s22 + $0x68] sm:$0xff]  ;;  %v200_v43 = vld [vmem:[%s709_s22 + $0x70] sm:$0xff]  ;;  %vm378_vm1 = vcmask (!%p448_p6), 1040384  }
  0x1a   : > { %583 = vmatpush3.bf16.msra.mxu1 %v582_v14  ;;  %v588_v22 = vpack.c.bf16 %v282_v18, %v281_v17  ;;  %v285_v29 = vmul.f32 %v194_v25, %v194_v25  ;;  %v286_v30 = vmul.f32 %v195_v26, %v195_v26  ;;  %v570_v33 = vpack.c.bf16 %v195_v26, %v194_v25  ;;  %v201_v44 = vld [vmem:[%s709_s22 + $0x78] sm:$0xff]  ;;  %v447_v51 = vld [vmem:[%s166_s18] ss:$0 sm:$0xff]  ;;  %v202_v53 = vld [vmem:[#allocation3] sm:$0xff] }
  0x1b   : > { %584 = vmatprep.subr.bf16.mxu1 %v663_v4  ;;  %v591_v28 = vpack.c.bf16 %v284_v24, %v283_v23  ;;  %v287_v35 = vmul.f32 %v196_v31, %v196_v31  ;;  %v288_v36 = vmul.f32 %v197_v32, %v197_v32  ;;  %v573_v39 = vpack.c.bf16 %v197_v32, %v196_v31  ;;  %v275_v55 = vld [vmem:[#allocation2] sm:$0xff] }
  0x1c   : > { %562 = vmatpush3.bf16.msra.mxu0 %v561_v15  ;;  %v594_v34 = vpack.c.bf16 %v286_v30, %v285_v29  ;;  %v289_v41 = vmul.f32 %v198_v37, %v198_v37  ;;  %v290_v42 = vmul.f32 %v199_v38, %v199_v38  ;;  %v576_v45 = vpack.c.bf16 %v199_v38, %v198_v37  ;;  %v369_v61 = vld [vmem:[%s783_s2] sm:$0x1] (!%p448_p6) }
  0x1d   : > { %563 = vmatprep.subr.bf16.mxu0 %v663_v4  ;;  %v597_v40 = vpack.c.bf16 %v288_v36, %v287_v35  ;;  %v291_v47 = vmul.f32 %v200_v43, %v200_v43  ;;  %v292_v48 = vmul.f32 %v201_v44, %v201_v44  ;;  %v579_v49 = vpack.c.bf16 %v201_v44, %v200_v43 }
  0x1e   : > { %586 = vmatpush3.bf16.msra.mxu1 %v585_v16  ;;  %v600_v46 = vpack.c.bf16 %v290_v42, %v289_v41  ;;  %v276_v52 = vmul.f32 %v447_v51, %v447_v51  ;;  %v372_v63 = vmul.f32 (!%p448_p6), 2.0, %v369_v61  ;;  %v375_v0 = vmul.f32 (!%p448_p6), 320.0, %v369_v61 }
  0x1f   : > { %587 = vmatprep.subr.bf16.mxu1 %v663_v4  ;;  %v603_v50 = vpack.c.bf16 %v292_v48, %v291_v47  ;;  %vm383_vm2 = vcmask (!%p448_p6), 0  }
  0x20   : > { %565 = vmatpush3.bf16.msra.mxu0 %v564_v21  ;;  %v376_v3 = vmul.f32 (!%p448_p6), %v375_v0, %v369_v61 }
  0x21   : > { %566 = vmatprep.subr.bf16.mxu0 %v663_v4 }
  0x22   : > { %589 = vmatpush3.bf16.msra.mxu1 %v588_v22 }
  0x23   : > { %590 = vmatprep.subr.bf16.mxu1 %v663_v4 }
  0x24   : > { %568 = vmatpush3.bf16.msra.mxu0 %v567_v27 }
  0x25   : > { %569 = vmatprep.subr.bf16.mxu0 %v663_v4 }
  0x26   : > { %592 = vmatpush3.bf16.msra.mxu1 %v591_v28 }
  0x27   : > { %593 = vmatprep.subr.bf16.mxu1 %v663_v4 }
  0x28   : > { %571 = vmatpush3.bf16.msra.mxu0 %v570_v33 }
  0x29   : > { %572 = vmatprep.subr.bf16.mxu0 %v663_v4 }
  0x2a   : > { %595 = vmatpush3.bf16.msra.mxu1 %v594_v34 }
  0x2b   : > { %596 = vmatprep.subr.bf16.mxu1 %v663_v4 }
  0x2c   : > { %574 = vmatpush3.bf16.msra.mxu0 %v573_v39 }
  0x2d   : > { %575 = vmatprep.subr.bf16.mxu0 %v663_v4 }
  0x2e   : > { %598 = vmatpush3.bf16.msra.mxu1 %v597_v40 }
  0x2f   : > { %599 = vmatprep.subr.bf16.mxu1 %v663_v4 }
  0x30   : > { %577 = vmatpush3.bf16.msra.mxu0 %v576_v45 }
  0x31   : > { %578 = vmatprep.subr.bf16.mxu0 %v663_v4 }
  0x32   : > { %601 = vmatpush3.bf16.msra.mxu1 %v600_v46 }
  0x33   : > { %602 = vmatprep.subr.bf16.mxu1 %v663_v4 }
  0x34   : > { %580 = vmatpush3.bf16.msra.mxu0 %v579_v49 }
  0x36   : > { %604 = vmatpush3.bf16.msra.mxu1 %v603_v50 }
  0x37   : > { %520 = vmatmul.mubr.f32.vlgmr.msra.gmra.mrb[0].mxu0 %v447_v51 }
  0x39   : > { %555 = vmatmul.mubr.f32.vlgmr.msra.gmra.mrb[0].mxu1 %v276_v52 }
 0x109   : > { %368 = sbr.rel (%p448_p6) target bundleno = 429 (0x1ad), region = 40 }
 0x10a   : > { %v269_v54 = vpop.f32.mrb[0].mxu0 }
 0x10b   : > { %v273_v56 = vadd.f32 %v269_v54, %v202_v53  ;;  %v521_v57 = vpop.f32.mrb[1].mxu0 }
 0x10c   : > { %v359_v58 = vpop.f32.mrb[0].mxu1 }
 0x10d   : > { %274 = vst [vmem:[#allocation3] sm:$0xff] %v273_v56  ;;  %v363_v59 = vadd.f32 %v359_v58, %v275_v55  ;;  %v556_v60 = vpop.f32.mrb[1].mxu1 }
 0x10f   : > { %364 = vst [vmem:[#allocation2] sm:$0xff] %v363_v59 }
 0x114   : > { %v371_v62 = vld [vmem:[#allocation3] sm:$0x1] }
 0x115   : > { %v373_v2 = vmul.f32 %v372_v63, %v371_v62 }
 0x116   : > { %v370_v1 = vld [vmem:[#allocation2] sm:$0x1] }
 0x117   : > { %v374_v4 = vsub.f32 %v370_v1, %v373_v2 }
 0x119   : > { %v377_v5 = vadd.f32 %v376_v3, %v374_v4 }
 0x11b   : > { %v379_v6 = vsel %vm378_vm1, %v377_v5, 0.0 }
 0x11c   : > { %380 = vadd.xlane.f32.xlu0 %v379_v6 }
 0x1a9   : > { %v381_v7 = vpop.xlane.xlu0 %380 }
 0x1aa   : > { %v382_v8 = vmul.f32 1.6276043e-05, %v381_v7 }
 0x1ac   : > { %384 = vst.msk [vmem:[#allocation4] sm:$0x1] %vm383_vm2, %v382_v8 }
 0x1ad PF: > { %p609_p7 = scmp.eq.s32.totalorder %s693_s13, 2  ;;  %s666_s27 = smov [#allocation4]  }
 0x1ae   : > { %s392_s28 = sshll.u32 %s666_s27, 4  ;;  %s393_s28 = int_to_ptr.vmem [resolvable:$true] %s392_s28 }
 0x1af   : > { %s624_s29 = scalar_lea.vmem %s393_s28, 16  ;;  %s630_s30 = scalar_lea.vmem %s393_s28, 32 }
 0x1b0   : > { %p625_p8 = scmp.ne.s32.totalorder %s393_s28, %s624_s29  ;;  %p631_p11 = scmp.lt.s32.totalorder %s393_s28, %s393_s28 }
 0x1b1   : > { %p632_p12 = scmp.lt.s32.totalorder %s630_s30, %s624_s29 }
 0x1b2   : > { %p626_p9 = pnand %p625_p8, %p609_p7 }
 0x1b3   : > { %p633_p13 = por %p632_p12, %p631_p11 }
 0x1b4   : > { %p627_p10 = pneg %p626_p9 }
 0x1b6   : > { %p634_p0 = pnand %p633_p13, %p627_p10 }
 0x1b8   : > { %637 = shalt.err (!%p634_p0)
}
 0x1b9   : > { %s638_s6 = scalar_lea.hbm %s784_s3, 16 }
 0x1ba   : > { %p639_p1 = scmp.ne.s32.totalorder %s784_s3, %s638_s6  ;;  %p644_p4 = scmp.lt.u32.totalorder %s638_s6, %s784_s3 }
 0x1bc   : > { %p640_p2 = pnand %p639_p1, %p609_p7 }
 0x1be   : > { %p641_p3 = pneg %p640_p2 }
 0x1c0   : > { %p646_p5 = pnand %p644_p4, %p641_p3 }
 0x1c2   : > { %649 = shalt.err (!%p646_p5)
}
 0x1c3   : > { %606 = dma.vmem_to_hbm [thread:$0]  (%p609_p7), %s393_s28, 16, %s784_s3, [#allocation5]  }
 0x1c4   : > { %655 = dma.done.wait (%p609_p7), [#allocation5], 16  }
 0x1c5   : > { %657 = vsyncadd (%p609_p7), [#allocation5], 4294967280 }
 0x1c6 PF: > { %s14_s12 = sadd.s32 1, %s660_s12  }
 0x1c7   : > { %p11_p6 = scmp.ge.s32.totalorder %s14_s12, 5  }
 0x1c9   :  { %13 = sbr.rel (!%p11_p6) target bundleno = 1 (0x1), region = 70 }
 0x1d0   :  { %405 = vsyncpa [#allocation5], 1 }
 0x1d1   :  { %407 = vsyncpa [#allocation5 + $0x1], 1 }

</bundles_post_ra>
